<compile_context>
chip_gen: v6e
topology: v6e:2x2x1
jax: 0.10.0
libtpu: 0.0.40
codegen_flags: <defaults>
</compile_context>

<pallas_src>
import functools

import jax
import jax.numpy as jnp
from jax.experimental import pallas as pl
from jax.experimental.pallas import tpu as pltpu


def _round_up(x, m):
    return ((x + m - 1) // m) * m


def _pad_to(x, shape, value=0.0):
    pads = [(0, t - s) for s, t in zip(x.shape, shape)]
    return jnp.pad(x, pads, constant_values=value)


def _sdpa_kernel(q_ref, k_ref, v_ref, bias_ref, out_ref, attn_ref, *, inv_temp):
    # scores: batched MXU contraction  [BB,Lq,Dk] x [BB,Lk,Dk] -> [BB,Lq,Lk]
    scores = jnp.einsum("bqd,bkd->bqk", q_ref[...], k_ref[...],
                        preferred_element_type=jnp.float32)
    scores = scores * inv_temp + bias_ref[...]          # additive mask (pre-biased)

    # numerically-stable softmax over the key axis (f32 throughout)
    m = jnp.max(scores, axis=-1, keepdims=True)
    e = jnp.exp(scores - m)
    denom = jnp.sum(e, axis=-1, keepdims=True)
    p = e * pl.reciprocal(denom, approx=True)           # EUP slot, frees VALU

    attn_ref[...] = p.astype(attn_ref.dtype)

    # TODO(synk): attention dropout (train mode) not implemented; eval == identity.
    out_ref[...] = jnp.einsum("bqk,bkd->bqd", p.astype(v_ref.dtype), v_ref[...],
                              preferred_element_type=jnp.float32
                              ).astype(out_ref.dtype)


def scaled_dot_product_attention(q, k, v, mask=None, *, temperature,
                                 batch_block=8, use_bf16_matmul=False):
    """Pallas-TPU ScaledDotProductAttention.forward (eval mode).

    q [B,Lq,Dk], k [B,Lk,Dk], v [B,Lk,Dv], mask [B,Lq,Lk] (True == masked).
    Returns (output [B,Lq,Dv], attn [B,Lq,Lk]), both float32.
    """
    B, Lq, Dk = q.shape
    _, Lk, _ = k.shape
    Dv = v.shape[-1]

    # --- pad to TPU-friendly shapes: lane-dense outputs + aligned MXU tiles ----
    Bp = _round_up(B, batch_block)
    Lqp = _round_up(Lq, 8)        # sublane dim of q / scores / outputs
    Lkp = _round_up(Lk, 128)      # lane dim of attn + contraction dim of attn@v
    Dkp = _round_up(Dk, 128)      # lane dim of q/k + contraction dim of q@k^T
    Dvp = _round_up(Dv, 128)      # lane dim of v / output
    # NOTE(v7x): keep batch_block * (Lkp*Dkp + Lkp*Dvp) * bytes * 2 buffers well
    # under the 32 MiB scoped-VMEM default (64 MiB physical per TC on v7x).

    mm_dtype = jnp.bfloat16 if use_bf16_matmul else jnp.float32
    q_p = _pad_to(q.astype(mm_dtype), (Bp, Lqp, Dkp))
    k_p = _pad_to(k.astype(mm_dtype), (Bp, Lkp, Dkp))
    v_p = _pad_to(v.astype(mm_dtype), (Bp, Lkp, Dvp))

    # additive mask: real masked positions get -1e10 (== torch masked_fill value);
    # padded key columns get -1e30 so they vanish even if every real key is masked.
    if mask is None:
        bias = jnp.zeros((B, Lq, Lk), jnp.float32)
    else:
        bias = jnp.where(mask.astype(jnp.bool_), jnp.float32(-1e10), jnp.float32(0.0))
    bias_p = _pad_to(bias, (Bp, Lqp, Lkp), value=jnp.float32(-1e30))

    kernel = functools.partial(_sdpa_kernel, inv_temp=float(1.0 / temperature))

    def _blk(rows, cols):
        return pl.BlockSpec((batch_block, rows, cols), lambda b: (b, 0, 0))

    out_p, attn_p = pl.pallas_call(
        kernel,
        grid_spec=pltpu.PrefetchScalarGridSpec(
            num_scalar_prefetch=0,
            grid=(Bp // batch_block,),
            in_specs=[_blk(Lqp, Dkp),    # q
                      _blk(Lkp, Dkp),    # k
                      _blk(Lkp, Dvp),    # v
                      _blk(Lqp, Lkp)],   # mask bias
            out_specs=[_blk(Lqp, Dvp),   # output
                       _blk(Lqp, Lkp)],  # attn
        ),
        out_shape=(jax.ShapeDtypeStruct((Bp, Lqp, Dvp), jnp.float32),
                   jax.ShapeDtypeStruct((Bp, Lqp, Lkp), jnp.float32)),
        compiler_params=pltpu.CompilerParams(
            dimension_semantics=("parallel",)),
    )(q_p, k_p, v_p, bias_p)

    return out_p[:B, :Lq, :Dv], attn_p[:B, :Lq, :Lk]


def _reference(q, k, v, mask, temperature):
    """Pure-JAX reference mirroring the torch module (eval mode)."""
    attn = jnp.einsum("bqd,bkd->bqk", q, k) / temperature
    if mask is not None:
        attn = jnp.where(mask, jnp.float32(-1e10), attn)
    attn = jax.nn.softmax(attn, axis=-1)
    out = jnp.einsum("bqk,bkd->bqd", attn, v)
    return out, attn


if __name__ == "__main__":
    key = jax.random.PRNGKey(0)
    B, Lq, Lk, Dk, Dv = 2, 8, 8, 32, 32
    ks = jax.random.split(key, 4)

    q = jax.random.normal(ks[0], (B, Lq, Dk), jnp.float32)
    k = jax.random.normal(ks[1], (B, Lk, Dk), jnp.float32)
    v = jax.random.normal(ks[2], (B, Lk, Dv), jnp.float32)
    mask = jax.random.bernoulli(ks[3], 0.3, (B, Lq, Lk))   # True == masked position
    temperature = float(Dk) ** 0.5

    out, attn = scaled_dot_product_attention(q, k, v, mask, temperature=temperature)
    jax.block_until_ready((out, attn))
    assert out.shape == (B, Lq, Dv) and attn.shape == (B, Lq, Lk)

    out_ref, attn_ref = _reference(q, k, v, mask, temperature)
    assert jnp.allclose(out, out_ref, atol=2e-2, rtol=2e-2)
    assert jnp.allclose(attn, attn_ref, atol=2e-2, rtol=2e-2)
    print("KERNEL_OK")
</pallas_src>

<mosaic_0001>
module attributes {stable_mosaic.version = 11 : i64} {
  func.func @_sdpa_kernel(%arg0: i32, %arg1: memref<8x8x128xf32, #tpu.memory_space<vmem>>, %arg2: memref<8x128x128xf32, #tpu.memory_space<vmem>>, %arg3: memref<8x128x128xf32, #tpu.memory_space<vmem>>, %arg4: memref<8x8x128xf32, #tpu.memory_space<vmem>>, %arg5: memref<8x8x128xf32, #tpu.memory_space<vmem>>, %arg6: memref<8x8x128xf32, #tpu.memory_space<vmem>>) attributes {dimension_semantics = [#tpu.dimension_semantics<parallel>], iteration_bounds = array<i64: 1>, scalar_prefetch = 0 : i64, scratch_operands = 0 : i64, tpu.core_type = #tpu.core_type<tc>, window_params = [{transform_indices = @transform_0, window_bounds = array<i64: 8, 8, 128>}, {transform_indices = @transform_1, window_bounds = array<i64: 8, 128, 128>}, {transform_indices = @transform_2, window_bounds = array<i64: 8, 128, 128>}, {transform_indices = @transform_3, window_bounds = array<i64: 8, 8, 128>}, {transform_indices = @transform_4, window_bounds = array<i64: 8, 8, 128>}, {transform_indices = @transform_5, window_bounds = array<i64: 8, 8, 128>}]} {
    %c0 = arith.constant 0 : index
    %c0_0 = arith.constant 0 : index
    %c0_1 = arith.constant 0 : index
    %0 = vector.load %arg1[%c0, %c0_0, %c0_1] : memref<8x8x128xf32, #tpu.memory_space<vmem>>, vector<8x8x128xf32>
    %c0_2 = arith.constant 0 : index
    %c0_3 = arith.constant 0 : index
    %c0_4 = arith.constant 0 : index
    %1 = vector.load %arg2[%c0_2, %c0_3, %c0_4] : memref<8x128x128xf32, #tpu.memory_space<vmem>>, vector<8x128x128xf32>
    "tpu.trace_start"() <{level = 10 : i32, message = "bqd,bkd->bqk"}> : () -> ()
    %cst = arith.constant dense<0.000000e+00> : vector<8x8x128xf32>
    %2 = tpu.matmul %0, %1, %cst {dimension_numbers = #tpu.dot_dimension_numbers<[2], [2], [1], [1], [0, 0, 0, 1, 1, 1], [0], [0]>} : vector<8x8x128xf32>, vector<8x128x128xf32>, vector<8x8x128xf32> -> vector<8x8x128xf32>
    "tpu.trace_stop"() : () -> ()
    %cst_5 = arith.constant 0.176776692 : f32
    %3 = vector.broadcast %cst_5 : f32 to vector<8x8x128xf32>
    %4 = arith.mulf %2, %3 : vector<8x8x128xf32>
    %c0_6 = arith.constant 0 : index
    %c0_7 = arith.constant 0 : index
    %c0_8 = arith.constant 0 : index
    %5 = vector.load %arg4[%c0_6, %c0_7, %c0_8] : memref<8x8x128xf32, #tpu.memory_space<vmem>>, vector<8x8x128xf32>
    %6 = arith.addf %4, %5 : vector<8x8x128xf32>
    %cst_9 = arith.constant dense<0xFF800000> : vector<8x8xf32>
    %7 = vector.multi_reduction <maximumf>, %6, %cst_9 [2] : vector<8x8x128xf32> to vector<8x8xf32>
    %8 = vector.shape_cast %7 : vector<8x8xf32> to vector<8x8x1xf32>
    %9 = vector.broadcast %8 : vector<8x8x1xf32> to vector<8x8x128xf32>
    %10 = arith.subf %6, %9 : vector<8x8x128xf32>
    %11 = math.exp %10 : vector<8x8x128xf32>
    %cst_10 = arith.constant dense<0.000000e+00> : vector<8x8xf32>
    %12 = vector.multi_reduction <add>, %11, %cst_10 [2] : vector<8x8x128xf32> to vector<8x8xf32>
    %13 = vector.shape_cast %12 : vector<8x8xf32> to vector<8x8x1xf32>
    %14 = tpu.reciprocal %13 {approx = true} : vector<8x8x1xf32> -> vector<8x8x1xf32>
    %15 = vector.broadcast %14 : vector<8x8x1xf32> to vector<8x8x128xf32>
    %16 = arith.mulf %11, %15 : vector<8x8x128xf32>
    %c0_11 = arith.constant 0 : index
    %c0_12 = arith.constant 0 : index
    %c0_13 = arith.constant 0 : index
    %17 = vector.load %arg6[%c0_11, %c0_12, %c0_13] : memref<8x8x128xf32, #tpu.memory_space<vmem>>, vector<8x8x128xf32>
    tpu.vector_store %arg6[%c0_11, %c0_12, %c0_13], %16 {strides = array<i32>} : memref<8x8x128xf32, #tpu.memory_space<vmem>>, vector<8x8x128xf32>,
    %c0_14 = arith.constant 0 : index
    %c0_15 = arith.constant 0 : index
    %c0_16 = arith.constant 0 : index
    %18 = vector.load %arg3[%c0_14, %c0_15, %c0_16] : memref<8x128x128xf32, #tpu.memory_space<vmem>>, vector<8x128x128xf32>
    "tpu.trace_start"() <{level = 10 : i32, message = "bqk,bkd->bqd"}> : () -> ()
    %cst_17 = arith.constant dense<0.000000e+00> : vector<8x8x128xf32>
    %19 = tpu.matmul %16, %18, %cst_17 {dimension_numbers = #tpu.dot_dimension_numbers<[2], [1], [1], [2], [0, 0, 0, 1, 1, 2], [0], [0]>} : vector<8x8x128xf32>, vector<8x128x128xf32>, vector<8x8x128xf32> -> vector<8x8x128xf32>
    "tpu.trace_stop"() : () -> ()
    %c0_18 = arith.constant 0 : index
    %c0_19 = arith.constant 0 : index
    %c0_20 = arith.constant 0 : index
    %20 = vector.load %arg5[%c0_18, %c0_19, %c0_20] : memref<8x8x128xf32, #tpu.memory_space<vmem>>, vector<8x8x128xf32>
    tpu.vector_store %arg5[%c0_18, %c0_19, %c0_20], %19 {strides = array<i32>} : memref<8x8x128xf32, #tpu.memory_space<vmem>>, vector<8x8x128xf32>,
    return
  }
  func.func @transform_0(%arg0: i32) -> (i32, i32, i32) {
    %c0_i32 = arith.constant 0 : i32
    %c0_i32_0 = arith.constant 0 : i32
    %c0_i32_1 = arith.constant 0 : i32
    return %arg0, %c0_i32, %c0_i32_0 : i32, i32, i32
  }
  func.func @transform_1(%arg0: i32) -> (i32, i32, i32) {
    %c0_i32 = arith.constant 0 : i32
    %c0_i32_0 = arith.constant 0 : i32
    %c0_i32_1 = arith.constant 0 : i32
    return %arg0, %c0_i32, %c0_i32_0 : i32, i32, i32
  }
  func.func @transform_2(%arg0: i32) -> (i32, i32, i32) {
    %c0_i32 = arith.constant 0 : i32
    %c0_i32_0 = arith.constant 0 : i32
    %c0_i32_1 = arith.constant 0 : i32
    return %arg0, %c0_i32, %c0_i32_0 : i32, i32, i32
  }
  func.func @transform_3(%arg0: i32) -> (i32, i32, i32) {
    %c0_i32 = arith.constant 0 : i32
    %c0_i32_0 = arith.constant 0 : i32
    %c0_i32_1 = arith.constant 0 : i32
    return %arg0, %c0_i32, %c0_i32_0 : i32, i32, i32
  }
  func.func @transform_4(%arg0: i32) -> (i32, i32, i32) {
    %c0_i32 = arith.constant 0 : i32
    %c0_i32_0 = arith.constant 0 : i32
    %c0_i32_1 = arith.constant 0 : i32
    return %arg0, %c0_i32, %c0_i32_0 : i32, i32, i32
  }
  func.func @transform_5(%arg0: i32) -> (i32, i32, i32) {
    %c0_i32 = arith.constant 0 : i32
    %c0_i32_0 = arith.constant 0 : i32
    %c0_i32_1 = arith.constant 0 : i32
    return %arg0, %c0_i32, %c0_i32_0 : i32, i32, i32
  }
}

</mosaic_0001>

<bundles_post_ra>
// kernel: tpu_custom_call.1
= control target key start
LH: loop header
LB: loop body
LE: loop exit
PB: predicated region body
PF: predicated region fallthrough
CT: control target
= control target key end

     0   :  { %11 = vsyncpa [#allocation3], 0  ;;  %s3031_s0 = inlined_call_operand.hbm [shape: f32[8,8,128], index: 0, kind: input, shape index: {}]   ;;  %s3032_s1 = inlined_call_operand.hbm [shape: f32[8,128,128], index: 1, kind: input, shape index: {}]   ;;  %s3033_s2 = inlined_call_operand.hbm [shape: f32[8,128,128], index: 2, kind: input, shape index: {}]   ;;  %s3034_s3 = inlined_call_operand.hbm [shape: f32[8,8,128], index: 3, kind: input, shape index: {}]   ;;  %s3035_s4 = inlined_call_operand.hbm [shape: f32[8,8,128], index: 4, kind: output, shape index: {0}]   ;;  %s3036_s5 = inlined_call_operand.hbm [shape: f32[8,8,128], index: 5, kind: output, shape index: {1}]  }
   0x1   :  { %12 = vsyncpa [#allocation6], 0 }
   0x2   :  { %13 = vsyncpa [#allocation9], 0 }
   0x3   :  { %14 = vsyncpa [#allocation4], 0 }
   0x4   :  { %15 = vsyncpa [#allocation12], 0  ;;  %s2611_s18 = smov [#allocation5]   ;;  %s2612_s20 = smov [#allocation2]  }
   0x5   :  { %s33_s19 = sshll.u32 %s2611_s18, 4  ;;  %s21_s21 = sshll.u32 %s2612_s20, 4  ;;  %s34_s19 = int_to_ptr.vmem [resolvable:$true] %s33_s19  ;;  %s22_s21 = int_to_ptr.vmem [resolvable:$true] %s21_s21 }
   0x6   :  { %s2489_s22 = scalar_lea.vmem %s34_s19, 16384  ;;  %p2494_p1 = scmp.lt.s32.totalorder %s34_s19, %s34_s19 }
   0x7   :  { %p2490_p0 = scmp.ne.s32.totalorder %s34_s19, %s2489_s22  ;;  %p2495_p2 = scmp.lt.s32.totalorder %s2489_s22, %s2489_s22 }
   0x9   :  { %p2496_p3 = por %p2495_p2, %p2494_p1 }
   0xb   :  { %p2497_p4 = pnand %p2496_p3, %p2490_p0 }
   0xd   :  { %2500 = shalt.err (!%p2497_p4)
}
   0xe   :  { %s2613_s23 = smov 128   ;;  %s2614_s24 = smov 8  }
   0xf   :  { %39 = dma.hbm_to_vmem [thread:$0]  %s3032_s1, 16384, %s34_s19, [#allocation6], %s2613_s23, %s2613_s23, %s2614_s24  }
  0x10   :  { %s2509_s27 = scalar_lea.vmem %s22_s21, 1024  ;;  %p2514_p6 = scmp.lt.s32.totalorder %s22_s21, %s22_s21 }
  0x11   :  { %p2510_p5 = scmp.ne.s32.totalorder %s22_s21, %s2509_s27  ;;  %p2515_p7 = scmp.lt.s32.totalorder %s2509_s27, %s2509_s27 }
  0x13   :  { %p2516_p8 = por %p2515_p7, %p2514_p6 }
  0x15   :  { %p2517_p9 = pnand %p2516_p8, %p2510_p5 }
  0x17   :  { %2520 = shalt.err (!%p2517_p9)
}
  0x18   :  { %27 = dma.hbm_to_vmem [thread:$0]  %s3031_s0, 1024, %s22_s21, [#allocation3], %s2613_s23, %s2613_s23, %s2614_s24  }
  0x19   :  { %s2615_s30 = smov [#allocation7]   ;;  %s2616_s7 = smov [#allocation8]  }
  0x1a   :  { %s45_s6 = sshll.u32 %s2615_s30, 4  ;;  %s57_s8 = sshll.u32 %s2616_s7, 4  ;;  %s46_s6 = int_to_ptr.vmem [resolvable:$true] %s45_s6  ;;  %s58_s8 = int_to_ptr.vmem [resolvable:$true] %s57_s8 }
  0x1b   :  { %s2529_s1 = scalar_lea.vmem %s46_s6, 16384  ;;  %p2534_p11 = scmp.lt.s32.totalorder %s46_s6, %s46_s6 }
  0x1c   :  { %p2530_p10 = scmp.ne.s32.totalorder %s46_s6, %s2529_s1  ;;  %p2535_p12 = scmp.lt.s32.totalorder %s2529_s1, %s2529_s1 }
  0x1e   :  { %p2536_p13 = por %p2535_p12, %p2534_p11 }
  0x20   :  { %p2537_p0 = pnand %p2536_p13, %p2530_p10 }
  0x22   :  { %2540 = shalt.err (!%p2537_p0)
}
  0x23   :  { %51 = dma.hbm_to_vmem [thread:$0]  %s3033_s2, 16384, %s46_s6, [#allocation6], %s2613_s23, %s2613_s23, %s2614_s24  }
  0x24   :  { %s2549_s0 = scalar_lea.vmem %s58_s8, 1024  ;;  %p2554_p2 = scmp.lt.s32.totalorder %s58_s8, %s58_s8 }
  0x25   :  { %p2550_p1 = scmp.ne.s32.totalorder %s58_s8, %s2549_s0  ;;  %p2555_p3 = scmp.lt.s32.totalorder %s2549_s0, %s2549_s0 }
  0x27   :  { %p2556_p4 = por %p2555_p3, %p2554_p2 }
  0x29   :  { %p2557_p5 = pnand %p2556_p4, %p2550_p1 }
  0x2b   :  { %2560 = shalt.err (!%p2557_p5)
}
  0x2c   :  { %63 = dma.hbm_to_vmem [thread:$0]  %s3034_s3, 1024, %s58_s8, [#allocation9], %s2613_s23, %s2613_s23, %s2614_s24  }
  0x2d   :  { %2601 = dma.done.wait [#allocation3], 1024  }
  0x2e   :  { %2602 = vsyncadd [#allocation3], 4294966272 }
  0x2f   :  { %2603 = dma.done.wait [#allocation6], 32768  }
  0x30   :  { %2604 = vsyncadd [#allocation6], 4294934528 }
  0x31   :  { %2605 = dma.done.wait [#allocation9], 1024  }
  0x32   :  { %2606 = vsyncadd [#allocation9], 4294966272  ;;  %v2617_v0 = vmov 0.0   ;;  %vm2618_vm0 = vmmov 0   ;;  %v99_v1 = vld [vmem:[#allocation5 + $0x78] sm:$0xff]  ;;  %v98_v3 = vld [vmem:[#allocation5 + $0x70] sm:$0xff] }
  0x33   :  { %1879 = vmatprep.subr.mxu0 %v2617_v0  ;;  %1914 = vmatprep.subr.mxu1 %v2617_v0  ;;  %v115_v2 = vld [vmem:[#allocation5 + $0xf8] sm:$0xff]  ;;  %v114_v4 = vld [vmem:[#allocation5 + $0xf0] sm:$0xff]  ;;  %v97_v5 = vld [vmem:[#allocation5 + $0x68] sm:$0xff]  ;;  %s2619_s2 = smov [#allocation11]  }
  0x34   :  { %1911 = vmatprep.mubr.msk.f32.mxu0 %vm2618_vm0, %v2617_v0  ;;  %1946 = vmatprep.mubr.msk.f32.mxu1 %vm2618_vm0, %v2617_v0  ;;  %v113_v6 = vld [vmem:[#allocation5 + $0xe8] sm:$0xff]  ;;  %v96_v7 = vld [vmem:[#allocation5 + $0x60] sm:$0xff]  ;;  %v95_v9 = vld [vmem:[#allocation5 + $0x58] sm:$0xff]  ;;  %s1589_s3 = sshll.u32 %s2619_s2, 4  ;;  %s1590_s3 = int_to_ptr.vmem [resolvable:$true] %s1589_s3 }
  0x35   :  { %1880 = vmatpush3.xpose.msra.mxu0 %v99_v1  ;;  %1915 = vmatpush3.xpose.msra.mxu1 %v115_v2  ;;  %v112_v8 = vld [vmem:[#allocation5 + $0xe0] sm:$0xff]  ;;  %v111_v10 = vld [vmem:[#allocation5 + $0xd8] sm:$0xff]  ;;  %v94_v11 = vld [vmem:[#allocation5 + $0x50] sm:$0xff]  ;;  %s2561_s13 = scalar_lea.vmem %s1590_s3, 1024  ;;  %p2566_p7 = scmp.lt.s32.totalorder %s1590_s3, %s1590_s3 }
  0x36   :  { %1881 = vmatprep.subr.mxu0 %v2617_v0  ;;  %1916 = vmatprep.subr.mxu1 %v2617_v0  ;;  %v110_v12 = vld [vmem:[#allocation5 + $0xd0] sm:$0xff]  ;;  %v93_v13 = vld [vmem:[#allocation5 + $0x48] sm:$0xff]  ;;  %v92_v15 = vld [vmem:[#allocation5 + $0x40] sm:$0xff]  ;;  %p2562_p6 = scmp.ne.s32.totalorder %s1590_s3, %s2561_s13  ;;  %p2567_p8 = scmp.lt.s32.totalorder %s2561_s13, %s2561_s13 }
  0x37   :  { %v109_v14 = vld [vmem:[#allocation5 + $0xc8] sm:$0xff]  ;;  %v108_v16 = vld [vmem:[#allocation5 + $0xc0] sm:$0xff]  ;;  %v91_v17 = vld [vmem:[#allocation5 + $0x38] sm:$0xff] }
  0x38   :  { %v107_v18 = vld [vmem:[#allocation5 + $0xb8] sm:$0xff]  ;;  %v90_v19 = vld [vmem:[#allocation5 + $0x30] sm:$0xff]  ;;  %v89_v21 = vld [vmem:[#allocation5 + $0x28] sm:$0xff]  ;;  %p2568_p9 = por %p2567_p8, %p2566_p7 }
  0x39   :  { %1882 = vmatpush3.xpose.msra.mxu0 %v98_v3  ;;  %1917 = vmatpush3.xpose.msra.mxu1 %v114_v4  ;;  %v106_v20 = vld [vmem:[#allocation5 + $0xb0] sm:$0xff]  ;;  %v105_v22 = vld [vmem:[#allocation5 + $0xa8] sm:$0xff]  ;;  %v88_v23 = vld [vmem:[#allocation5 + $0x20] sm:$0xff] }
  0x3a   :  { %1883 = vmatprep.subr.mxu0 %v2617_v0  ;;  %1918 = vmatprep.subr.mxu1 %v2617_v0  ;;  %v104_v24 = vld [vmem:[#allocation5 + $0xa0] sm:$0xff]  ;;  %v87_v25 = vld [vmem:[#allocation5 + $0x18] sm:$0xff]  ;;  %v86_v27 = vld [vmem:[#allocation5 + $0x10] sm:$0xff]  ;;  %p2569_p10 = pnand %p2568_p9, %p2562_p6 }
  0x3b   :  { %v103_v26 = vld [vmem:[#allocation5 + $0x98] sm:$0xff]  ;;  %v102_v28 = vld [vmem:[#allocation5 + $0x90] sm:$0xff]  ;;  %v85_v29 = vld [vmem:[#allocation5 + $0x8] sm:$0xff] }
  0x3c   :  { %v101_v30 = vld [vmem:[#allocation5 + $0x88] sm:$0xff]  ;;  %v84_v31 = vld [vmem:[#allocation5] sm:$0xff]  ;;  %v131_v35 = vld [vmem:[#allocation5 + $0x178] sm:$0xff] }
  0x3d   :  { %1884 = vmatpush3.xpose.msra.mxu0 %v97_v5  ;;  %1919 = vmatpush3.xpose.msra.mxu1 %v113_v6  ;;  %v100_v32 = vld [vmem:[#allocation5 + $0x80] sm:$0xff]  ;;  %v77_v34 = vld [vmem:[#allocation2 + $0x8] sm:$0xff]  ;;  %v147_v36 = vld [vmem:[#allocation5 + $0x1f8] sm:$0xff] }
  0x3e   :  { %1885 = vmatprep.subr.mxu0 %v2617_v0  ;;  %1920 = vmatprep.subr.mxu1 %v2617_v0  ;;  %v76_v33 = vld [vmem:[#allocation2] sm:$0xff]  ;;  %v130_v37 = vld [vmem:[#allocation5 + $0x170] sm:$0xff]  ;;  %v129_v39 = vld [vmem:[#allocation5 + $0x168] sm:$0xff] }
  0x3f   :  { %v146_v38 = vld [vmem:[#allocation5 + $0x1f0] sm:$0xff]  ;;  %v145_v40 = vld [vmem:[#allocation5 + $0x1e8] sm:$0xff]  ;;  %v128_v41 = vld [vmem:[#allocation5 + $0x160] sm:$0xff] }
  0x40   :  { %v144_v42 = vld [vmem:[#allocation5 + $0x1e0] sm:$0xff]  ;;  %v127_v43 = vld [vmem:[#allocation5 + $0x158] sm:$0xff]  ;;  %v126_v45 = vld [vmem:[#allocation5 + $0x150] sm:$0xff] }
  0x41   :  { %1886 = vmatpush3.xpose.msra.mxu0 %v96_v7  ;;  %1921 = vmatpush3.xpose.msra.mxu1 %v112_v8  ;;  %v143_v44 = vld [vmem:[#allocation5 + $0x1d8] sm:$0xff]  ;;  %v142_v46 = vld [vmem:[#allocation5 + $0x1d0] sm:$0xff]  ;;  %v125_v47 = vld [vmem:[#allocation5 + $0x148] sm:$0xff] }
  0x42   :  { %1887 = vmatprep.subr.mxu0 %v2617_v0  ;;  %1922 = vmatprep.subr.mxu1 %v2617_v0  ;;  %v141_v48 = vld [vmem:[#allocation5 + $0x1c8] sm:$0xff]  ;;  %v124_v49 = vld [vmem:[#allocation5 + $0x140] sm:$0xff]  ;;  %v123_v51 = vld [vmem:[#allocation5 + $0x138] sm:$0xff] }
  0x43   :  { %v140_v50 = vld [vmem:[#allocation5 + $0x1c0] sm:$0xff]  ;;  %v139_v52 = vld [vmem:[#allocation5 + $0x1b8] sm:$0xff]  ;;  %v122_v53 = vld [vmem:[#allocation5 + $0x130] sm:$0xff] }
  0x44   :  { %v138_v54 = vld [vmem:[#allocation5 + $0x1b0] sm:$0xff]  ;;  %v121_v55 = vld [vmem:[#allocation5 + $0x128] sm:$0xff]  ;;  %v120_v57 = vld [vmem:[#allocation5 + $0x120] sm:$0xff] }
  0x45   :  { %1888 = vmatpush3.xpose.msra.mxu0 %v95_v9  ;;  %1923 = vmatpush3.xpose.msra.mxu1 %v111_v10  ;;  %v137_v56 = vld [vmem:[#allocation5 + $0x1a8] sm:$0xff]  ;;  %v136_v58 = vld [vmem:[#allocation5 + $0x1a0] sm:$0xff]  ;;  %v119_v59 = vld [vmem:[#allocation5 + $0x118] sm:$0xff] }
  0x46   :  { %1889 = vmatprep.subr.mxu0 %v2617_v0  ;;  %1924 = vmatprep.subr.mxu1 %v2617_v0  ;;  %v135_v60 = vld [vmem:[#allocation5 + $0x198] sm:$0xff]  ;;  %v118_v61 = vld [vmem:[#allocation5 + $0x110] sm:$0xff]  ;;  %v117_v63 = vld [vmem:[#allocation5 + $0x108] sm:$0xff] }
  0x47   :  { %v134_v62 = vld [vmem:[#allocation5 + $0x190] sm:$0xff]  ;;  %v133_v1 = vld [vmem:[#allocation5 + $0x188] sm:$0xff]  ;;  %v116_v2 = vld [vmem:[#allocation5 + $0x100] sm:$0xff] }
  0x48   :  { %v132_v3 = vld [vmem:[#allocation5 + $0x180] sm:$0xff]  ;;  %v78_v4 = vld [vmem:[#allocation2 + $0x10] sm:$0xff]  ;;  %v79_v5 = vld [vmem:[#allocation2 + $0x18] sm:$0xff] }
  0x49   :  { %1890 = vmatpush3.xpose.msra.mxu0 %v94_v11  ;;  %1925 = vmatpush3.xpose.msra.mxu1 %v110_v12  ;;  %v163_v6 = vld [vmem:[#allocation5 + $0x278] sm:$0xff]  ;;  %v162_v8 = vld [vmem:[#allocation5 + $0x270] sm:$0xff]  ;;  %v161_v10 = vld [vmem:[#allocation5 + $0x268] sm:$0xff] }
  0x4a   :  { %1891 = vmatprep.subr.mxu0 %v2617_v0  ;;  %1926 = vmatprep.subr.mxu1 %v2617_v0  ;;  %v179_v7 = vld [vmem:[#allocation5 + $0x2f8] sm:$0xff]  ;;  %v178_v9 = vld [vmem:[#allocation5 + $0x2f0] sm:$0xff]  ;;  %v177_v11 = vld [vmem:[#allocation5 + $0x2e8] sm:$0xff] }
  0x4b   :  { %v160_v12 = vld [vmem:[#allocation5 + $0x260] sm:$0xff] }
  0x4d   :  { %1892 = vmatpush3.xpose.msra.mxu0 %v93_v13  ;;  %1927 = vmatpush3.xpose.msra.mxu1 %v109_v14  ;;  %v176_v13 = vld [vmem:[#allocation5 + $0x2e0] sm:$0xff]  ;;  %v159_v14 = vld [vmem:[#allocation5 + $0x258] sm:$0xff] }
  0x4e   :  { %1893 = vmatprep.subr.mxu0 %v2617_v0  ;;  %1928 = vmatprep.subr.mxu1 %v2617_v0 }
  0x51   :  { %1894 = vmatpush3.xpose.msra.mxu0 %v92_v15  ;;  %1929 = vmatpush3.xpose.msra.mxu1 %v108_v16  ;;  %v175_v15 = vld [vmem:[#allocation5 + $0x2d8] sm:$0xff]  ;;  %v158_v16 = vld [vmem:[#allocation5 + $0x250] sm:$0xff] }
  0x52   :  { %1895 = vmatprep.subr.mxu0 %v2617_v0  ;;  %1930 = vmatprep.subr.mxu1 %v2617_v0 }
  0x55   :  { %1896 = vmatpush3.xpose.msra.mxu0 %v91_v17  ;;  %1931 = vmatpush3.xpose.msra.mxu1 %v107_v18  ;;  %v174_v17 = vld [vmem:[#allocation5 + $0x2d0] sm:$0xff]  ;;  %v157_v18 = vld [vmem:[#allocation5 + $0x248] sm:$0xff] }
  0x56   :  { %1897 = vmatprep.subr.mxu0 %v2617_v0  ;;  %1932 = vmatprep.subr.mxu1 %v2617_v0 }
  0x59   :  { %1898 = vmatpush3.xpose.msra.mxu0 %v90_v19  ;;  %1933 = vmatpush3.xpose.msra.mxu1 %v106_v20  ;;  %v173_v19 = vld [vmem:[#allocation5 + $0x2c8] sm:$0xff]  ;;  %v156_v20 = vld [vmem:[#allocation5 + $0x240] sm:$0xff] }
  0x5a   :  { %1899 = vmatprep.subr.mxu0 %v2617_v0  ;;  %1934 = vmatprep.subr.mxu1 %v2617_v0 }
  0x5d   :  { %1900 = vmatpush3.xpose.msra.mxu0 %v89_v21  ;;  %1935 = vmatpush3.xpose.msra.mxu1 %v105_v22  ;;  %v172_v21 = vld [vmem:[#allocation5 + $0x2c0] sm:$0xff]  ;;  %v155_v22 = vld [vmem:[#allocation5 + $0x238] sm:$0xff] }
  0x5e   :  { %1901 = vmatprep.subr.mxu0 %v2617_v0  ;;  %1936 = vmatprep.subr.mxu1 %v2617_v0 }
  0x61   :  { %1902 = vmatpush3.xpose.msra.mxu0 %v88_v23  ;;  %1937 = vmatpush3.xpose.msra.mxu1 %v104_v24  ;;  %v171_v23 = vld [vmem:[#allocation5 + $0x2b8] sm:$0xff]  ;;  %v154_v24 = vld [vmem:[#allocation5 + $0x230] sm:$0xff] }
  0x62   :  { %1903 = vmatprep.subr.mxu0 %v2617_v0  ;;  %1938 = vmatprep.subr.mxu1 %v2617_v0 }
  0x65   :  { %1904 = vmatpush3.xpose.msra.mxu0 %v87_v25  ;;  %1939 = vmatpush3.xpose.msra.mxu1 %v103_v26  ;;  %v170_v25 = vld [vmem:[#allocation5 + $0x2b0] sm:$0xff]  ;;  %v153_v26 = vld [vmem:[#allocation5 + $0x228] sm:$0xff] }
  0x66   :  { %1905 = vmatprep.subr.mxu0 %v2617_v0  ;;  %1940 = vmatprep.subr.mxu1 %v2617_v0 }
  0x69   :  { %1906 = vmatpush3.xpose.msra.mxu0 %v86_v27  ;;  %1941 = vmatpush3.xpose.msra.mxu1 %v102_v28  ;;  %v169_v27 = vld [vmem:[#allocation5 + $0x2a8] sm:$0xff]  ;;  %v152_v28 = vld [vmem:[#allocation5 + $0x220] sm:$0xff] }
  0x6a   :  { %1907 = vmatprep.subr.mxu0 %v2617_v0  ;;  %1942 = vmatprep.subr.mxu1 %v2617_v0 }
  0x6d   :  { %1908 = vmatpush3.xpose.msra.mxu0 %v85_v29  ;;  %1943 = vmatpush3.xpose.msra.mxu1 %v101_v30  ;;  %v168_v29 = vld [vmem:[#allocation5 + $0x2a0] sm:$0xff]  ;;  %v151_v30 = vld [vmem:[#allocation5 + $0x218] sm:$0xff] }
  0x6e   :  { %1909 = vmatprep.subr.mxu0 %v2617_v0  ;;  %1944 = vmatprep.subr.mxu1 %v2617_v0 }
  0x71   :  { %1910 = vmatpush3.xpose.msra.mxu0 %v84_v31  ;;  %1945 = vmatpush3.xpose.msra.mxu1 %v100_v32  ;;  %v167_v31 = vld [vmem:[#allocation5 + $0x298] sm:$0xff]  ;;  %v150_v32 = vld [vmem:[#allocation5 + $0x210] sm:$0xff] }
  0x72   :  { %1949 = vmatprep.subr.mxu0 %v2617_v0  ;;  %1984 = vmatprep.subr.mxu1 %v2617_v0 }
  0x74   :  { %1912 = vmatmul.mubr.f32.vlgmr.msra.gmra.mxu0 %v76_v33  ;;  %1947 = vmatmul.mubr.f32.vlgmr.msra.gmra.mxu1 %v77_v34  ;;  %v166_v33 = vld [vmem:[#allocation5 + $0x290] sm:$0xff]  ;;  %v149_v34 = vld [vmem:[#allocation5 + $0x208] sm:$0xff] }
  0x75   :  { %1950 = vmatpush3.xpose.msra.mxu0 %v131_v35  ;;  %1985 = vmatpush3.xpose.msra.mxu1 %v147_v36  ;;  %v165_v35 = vld [vmem:[#allocation5 + $0x288] sm:$0xff]  ;;  %v148_v36 = vld [vmem:[#allocation5 + $0x200] sm:$0xff] }
  0x76   :  { %1951 = vmatprep.subr.mxu0 %v2617_v0  ;;  %1986 = vmatprep.subr.mxu1 %v2617_v0 }
  0x77   :  { %1981 = vmatprep.mubr.msk.f32.mxu0 %vm2618_vm0, %v2617_v0  ;;  %2016 = vmatprep.mubr.msk.f32.mxu1 %vm2618_vm0, %v2617_v0 }
  0x79   :  { %1952 = vmatpush3.xpose.msra.mxu0 %v130_v37  ;;  %1987 = vmatpush3.xpose.msra.mxu1 %v146_v38  ;;  %v164_v37 = vld [vmem:[#allocation5 + $0x280] sm:$0xff] }
  0x7a   :  { %1953 = vmatprep.subr.mxu0 %v2617_v0  ;;  %1988 = vmatprep.subr.mxu1 %v2617_v0  ;;  %v80_v38 = vld [vmem:[#allocation2 + $0x20] sm:$0xff] }
  0x7d   :  { %1954 = vmatpush3.xpose.msra.mxu0 %v129_v39  ;;  %1989 = vmatpush3.xpose.msra.mxu1 %v145_v40  ;;  %v81_v39 = vld [vmem:[#allocation2 + $0x28] sm:$0xff]  ;;  %v195_v40 = vld [vmem:[#allocation5 + $0x378] sm:$0xff] }
  0x7e   :  { %1955 = vmatprep.subr.mxu0 %v2617_v0  ;;  %1990 = vmatprep.subr.mxu1 %v2617_v0 }
  0x81   :  { %1956 = vmatpush3.xpose.msra.mxu0 %v128_v41  ;;  %1991 = vmatpush3.xpose.msra.mxu1 %v144_v42  ;;  %v211_v41 = vld [vmem:[#allocation5 + $0x3f8] sm:$0xff]  ;;  %v194_v42 = vld [vmem:[#allocation5 + $0x370] sm:$0xff] }
  0x82   :  { %1957 = vmatprep.subr.mxu0 %v2617_v0  ;;  %1992 = vmatprep.subr.mxu1 %v2617_v0 }
  0x85   :  { %1958 = vmatpush3.xpose.msra.mxu0 %v127_v43  ;;  %1993 = vmatpush3.xpose.msra.mxu1 %v143_v44  ;;  %v210_v43 = vld [vmem:[#allocation5 + $0x3f0] sm:$0xff]  ;;  %v193_v44 = vld [vmem:[#allocation5 + $0x368] sm:$0xff] }
  0x86   :  { %1959 = vmatprep.subr.mxu0 %v2617_v0  ;;  %1994 = vmatprep.subr.mxu1 %v2617_v0 }
  0x89   :  { %1960 = vmatpush3.xpose.msra.mxu0 %v126_v45  ;;  %1995 = vmatpush3.xpose.msra.mxu1 %v142_v46  ;;  %v209_v45 = vld [vmem:[#allocation5 + $0x3e8] sm:$0xff]  ;;  %v192_v46 = vld [vmem:[#allocation5 + $0x360] sm:$0xff] }
  0x8a   :  { %1961 = vmatprep.subr.mxu0 %v2617_v0  ;;  %1996 = vmatprep.subr.mxu1 %v2617_v0 }
  0x8d   :  { %1962 = vmatpush3.xpose.msra.mxu0 %v125_v47  ;;  %1997 = vmatpush3.xpose.msra.mxu1 %v141_v48  ;;  %v208_v47 = vld [vmem:[#allocation5 + $0x3e0] sm:$0xff]  ;;  %v191_v48 = vld [vmem:[#allocation5 + $0x358] sm:$0xff] }
  0x8e   :  { %1963 = vmatprep.subr.mxu0 %v2617_v0  ;;  %1998 = vmatprep.subr.mxu1 %v2617_v0 }
  0x91   :  { %1964 = vmatpush3.xpose.msra.mxu0 %v124_v49  ;;  %1999 = vmatpush3.xpose.msra.mxu1 %v140_v50  ;;  %v207_v49 = vld [vmem:[#allocation5 + $0x3d8] sm:$0xff]  ;;  %v190_v50 = vld [vmem:[#allocation5 + $0x350] sm:$0xff] }
  0x92   :  { %1965 = vmatprep.subr.mxu0 %v2617_v0  ;;  %2000 = vmatprep.subr.mxu1 %v2617_v0 }
  0x95   :  { %1966 = vmatpush3.xpose.msra.mxu0 %v123_v51  ;;  %2001 = vmatpush3.xpose.msra.mxu1 %v139_v52  ;;  %v206_v51 = vld [vmem:[#allocation5 + $0x3d0] sm:$0xff]  ;;  %v189_v52 = vld [vmem:[#allocation5 + $0x348] sm:$0xff] }
  0x96   :  { %1967 = vmatprep.subr.mxu0 %v2617_v0  ;;  %2002 = vmatprep.subr.mxu1 %v2617_v0 }
  0x99   :  { %1968 = vmatpush3.xpose.msra.mxu0 %v122_v53  ;;  %2003 = vmatpush3.xpose.msra.mxu1 %v138_v54  ;;  %v205_v53 = vld [vmem:[#allocation5 + $0x3c8] sm:$0xff]  ;;  %v188_v54 = vld [vmem:[#allocation5 + $0x340] sm:$0xff] }
  0x9a   :  { %1969 = vmatprep.subr.mxu0 %v2617_v0  ;;  %2004 = vmatprep.subr.mxu1 %v2617_v0 }
  0x9d   :  { %1970 = vmatpush3.xpose.msra.mxu0 %v121_v55  ;;  %2005 = vmatpush3.xpose.msra.mxu1 %v137_v56  ;;  %v204_v55 = vld [vmem:[#allocation5 + $0x3c0] sm:$0xff]  ;;  %v187_v56 = vld [vmem:[#allocation5 + $0x338] sm:$0xff] }
  0x9e   :  { %1971 = vmatprep.subr.mxu0 %v2617_v0  ;;  %2006 = vmatprep.subr.mxu1 %v2617_v0 }
  0xa1   :  { %1972 = vmatpush3.xpose.msra.mxu0 %v120_v57  ;;  %2007 = vmatpush3.xpose.msra.mxu1 %v136_v58  ;;  %v203_v57 = vld [vmem:[#allocation5 + $0x3b8] sm:$0xff]  ;;  %v186_v58 = vld [vmem:[#allocation5 + $0x330] sm:$0xff] }
  0xa2   :  { %1973 = vmatprep.subr.mxu0 %v2617_v0  ;;  %2008 = vmatprep.subr.mxu1 %v2617_v0 }
  0xa5   :  { %1974 = vmatpush3.xpose.msra.mxu0 %v119_v59  ;;  %2009 = vmatpush3.xpose.msra.mxu1 %v135_v60  ;;  %v202_v59 = vld [vmem:[#allocation5 + $0x3b0] sm:$0xff]  ;;  %v185_v60 = vld [vmem:[#allocation5 + $0x328] sm:$0xff] }
  0xa6   :  { %1975 = vmatprep.subr.mxu0 %v2617_v0  ;;  %2010 = vmatprep.subr.mxu1 %v2617_v0 }
  0xa9   :  { %1976 = vmatpush3.xpose.msra.mxu0 %v118_v61  ;;  %2011 = vmatpush3.xpose.msra.mxu1 %v134_v62  ;;  %v201_v61 = vld [vmem:[#allocation5 + $0x3a8] sm:$0xff]  ;;  %v184_v62 = vld [vmem:[#allocation5 + $0x320] sm:$0xff] }
  0xaa   :  { %1977 = vmatprep.subr.mxu0 %v2617_v0  ;;  %2012 = vmatprep.subr.mxu1 %v2617_v0 }
  0xad   :  { %1978 = vmatpush3.xpose.msra.mxu0 %v117_v63  ;;  %2013 = vmatpush3.xpose.msra.mxu1 %v133_v1  ;;  %v200_v63 = vld [vmem:[#allocation5 + $0x3a0] sm:$0xff]  ;;  %v183_v1 = vld [vmem:[#allocation5 + $0x318] sm:$0xff] }
  0xae   :  { %1979 = vmatprep.subr.mxu0 %v2617_v0  ;;  %2014 = vmatprep.subr.mxu1 %v2617_v0 }
  0xb1   :  { %1980 = vmatpush3.xpose.msra.mxu0 %v116_v2  ;;  %2015 = vmatpush3.xpose.msra.mxu1 %v132_v3  ;;  %v199_v2 = vld [vmem:[#allocation5 + $0x398] sm:$0xff]  ;;  %v182_v3 = vld [vmem:[#allocation5 + $0x310] sm:$0xff] }
  0xb2   :  { %2019 = vmatprep.subr.mxu0 %v2617_v0  ;;  %2054 = vmatprep.subr.mxu1 %v2617_v0 }
  0xb4   :  { %1982 = vmatmul.mubr.f32.vlgmr.msra.gmra.mxu0 %v78_v4  ;;  %2017 = vmatmul.mubr.f32.vlgmr.msra.gmra.mxu1 %v79_v5  ;;  %v198_v4 = vld [vmem:[#allocation5 + $0x390] sm:$0xff]  ;;  %v181_v5 = vld [vmem:[#allocation5 + $0x308] sm:$0xff] }
  0xb5   :  { %2020 = vmatpush3.xpose.msra.mxu0 %v163_v6  ;;  %2055 = vmatpush3.xpose.msra.mxu1 %v179_v7  ;;  %v197_v6 = vld [vmem:[#allocation5 + $0x388] sm:$0xff]  ;;  %v180_v7 = vld [vmem:[#allocation5 + $0x300] sm:$0xff] }
  0xb6   :  { %2021 = vmatprep.subr.mxu0 %v2617_v0  ;;  %2056 = vmatprep.subr.mxu1 %v2617_v0 }
  0xb7   :  { %2051 = vmatprep.mubr.msk.f32.mxu0 %vm2618_vm0, %v2617_v0  ;;  %2086 = vmatprep.mubr.msk.f32.mxu1 %vm2618_vm0, %v2617_v0 }
  0xb9   :  { %2022 = vmatpush3.xpose.msra.mxu0 %v162_v8  ;;  %2057 = vmatpush3.xpose.msra.mxu1 %v178_v9  ;;  %v196_v8 = vld [vmem:[#allocation5 + $0x380] sm:$0xff]  ;;  %v82_v9 = vld [vmem:[#allocation2 + $0x30] sm:$0xff] }
  0xba   :  { %2023 = vmatprep.subr.mxu0 %v2617_v0  ;;  %2058 = vmatprep.subr.mxu1 %v2617_v0 }
  0xbd   :  { %2024 = vmatpush3.xpose.msra.mxu0 %v161_v10  ;;  %2059 = vmatpush3.xpose.msra.mxu1 %v177_v11  ;;  %v83_v10 = vld [vmem:[#allocation2 + $0x38] sm:$0xff] }
  0xbe   :  { %2025 = vmatprep.subr.mxu0 %v2617_v0  ;;  %2060 = vmatprep.subr.mxu1 %v2617_v0 }
  0xc1   :  { %2026 = vmatpush3.xpose.msra.mxu0 %v160_v12  ;;  %2061 = vmatpush3.xpose.msra.mxu1 %v176_v13  ;;  %v780_v13 = vld [vmem:[#allocation8] sm:$0xff] }
  0xc2   :  { %2027 = vmatprep.subr.mxu0 %v2617_v0  ;;  %2062 = vmatprep.subr.mxu1 %v2617_v0 }
  0xc5   :  { %2028 = vmatpush3.xpose.msra.mxu0 %v159_v14  ;;  %2063 = vmatpush3.xpose.msra.mxu1 %v175_v15 }
  0xc6   :  { %2029 = vmatprep.subr.mxu0 %v2617_v0  ;;  %2064 = vmatprep.subr.mxu1 %v2617_v0 }
  0xc9   :  { %2030 = vmatpush3.xpose.msra.mxu0 %v158_v16  ;;  %2065 = vmatpush3.xpose.msra.mxu1 %v174_v17 }
  0xca   :  { %2031 = vmatprep.subr.mxu0 %v2617_v0  ;;  %2066 = vmatprep.subr.mxu1 %v2617_v0 }
  0xcd   :  { %2032 = vmatpush3.xpose.msra.mxu0 %v157_v18  ;;  %2067 = vmatpush3.xpose.msra.mxu1 %v173_v19  ;;  %v781_v19 = vld [vmem:[#allocation8 + $0x8] sm:$0xff] }
  0xce   :  { %2033 = vmatprep.subr.mxu0 %v2617_v0  ;;  %2068 = vmatprep.subr.mxu1 %v2617_v0 }
  0xd1   :  { %2034 = vmatpush3.xpose.msra.mxu0 %v156_v20  ;;  %2069 = vmatpush3.xpose.msra.mxu1 %v172_v21 }
  0xd2   :  { %2035 = vmatprep.subr.mxu0 %v2617_v0  ;;  %2070 = vmatprep.subr.mxu1 %v2617_v0 }
  0xd5   :  { %2036 = vmatpush3.xpose.msra.mxu0 %v155_v22  ;;  %2071 = vmatpush3.xpose.msra.mxu1 %v171_v23  ;;  %v782_v23 = vld [vmem:[#allocation8 + $0x10] sm:$0xff] }
  0xd6   :  { %2037 = vmatprep.subr.mxu0 %v2617_v0  ;;  %2072 = vmatprep.subr.mxu1 %v2617_v0 }
  0xd9   :  { %2038 = vmatpush3.xpose.msra.mxu0 %v154_v24  ;;  %2073 = vmatpush3.xpose.msra.mxu1 %v170_v25 }
  0xda   :  { %2039 = vmatprep.subr.mxu0 %v2617_v0  ;;  %2074 = vmatprep.subr.mxu1 %v2617_v0 }
  0xdd   :  { %2040 = vmatpush3.xpose.msra.mxu0 %v153_v26  ;;  %2075 = vmatpush3.xpose.msra.mxu1 %v169_v27 }
  0xde   :  { %2041 = vmatprep.subr.mxu0 %v2617_v0  ;;  %2076 = vmatprep.subr.mxu1 %v2617_v0 }
  0xe1   :  { %2042 = vmatpush3.xpose.msra.mxu0 %v152_v28  ;;  %2077 = vmatpush3.xpose.msra.mxu1 %v168_v29  ;;  %v783_v29 = vld [vmem:[#allocation8 + $0x18] sm:$0xff] }
  0xe2   :  { %2043 = vmatprep.subr.mxu0 %v2617_v0  ;;  %2078 = vmatprep.subr.mxu1 %v2617_v0 }
  0xe5   :  { %2044 = vmatpush3.xpose.msra.mxu0 %v151_v30  ;;  %2079 = vmatpush3.xpose.msra.mxu1 %v167_v31 }
  0xe6   :  { %2045 = vmatprep.subr.mxu0 %v2617_v0  ;;  %2080 = vmatprep.subr.mxu1 %v2617_v0 }
  0xe9   :  { %2046 = vmatpush3.xpose.msra.mxu0 %v150_v32  ;;  %2081 = vmatpush3.xpose.msra.mxu1 %v166_v33  ;;  %v785_v33 = vld [vmem:[#allocation8 + $0x28] sm:$0xff] }
  0xea   :  { %2047 = vmatprep.subr.mxu0 %v2617_v0  ;;  %2082 = vmatprep.subr.mxu1 %v2617_v0 }
  0xed   :  { %2048 = vmatpush3.xpose.msra.mxu0 %v149_v34  ;;  %2083 = vmatpush3.xpose.msra.mxu1 %v165_v35  ;;  %v784_v34 = vld [vmem:[#allocation8 + $0x20] sm:$0xff] }
  0xee   :  { %2049 = vmatprep.subr.mxu0 %v2617_v0  ;;  %2084 = vmatprep.subr.mxu1 %v2617_v0 }
  0xf1   :  { %2050 = vmatpush3.xpose.msra.mxu0 %v148_v36  ;;  %2085 = vmatpush3.xpose.msra.mxu1 %v164_v37 }
  0xf2   :  { %2089 = vmatprep.subr.mxu0 %v2617_v0  ;;  %2124 = vmatprep.subr.mxu1 %v2617_v0 }
  0xf4   :  { %2052 = vmatmul.mubr.f32.vlgmr.msra.gmra.mxu0 %v80_v38  ;;  %2087 = vmatmul.mubr.f32.vlgmr.msra.gmra.mxu1 %v81_v39 }
  0xf5   :  { %2090 = vmatpush3.xpose.msra.mxu0 %v195_v40  ;;  %2125 = vmatpush3.xpose.msra.mxu1 %v211_v41 }
  0xf6   :  { %2091 = vmatprep.subr.mxu0 %v2617_v0  ;;  %2126 = vmatprep.subr.mxu1 %v2617_v0 }
  0xf7   :  { %2121 = vmatprep.mubr.msk.f32.mxu0 %vm2618_vm0, %v2617_v0  ;;  %2156 = vmatprep.mubr.msk.f32.mxu1 %vm2618_vm0, %v2617_v0 }
  0xf9   :  { %2092 = vmatpush3.xpose.msra.mxu0 %v194_v42  ;;  %2127 = vmatpush3.xpose.msra.mxu1 %v210_v43 }
  0xfa   :  { %2093 = vmatprep.subr.mxu0 %v2617_v0  ;;  %2128 = vmatprep.subr.mxu1 %v2617_v0 }
  0xfd   :  { %2094 = vmatpush3.xpose.msra.mxu0 %v193_v44  ;;  %2129 = vmatpush3.xpose.msra.mxu1 %v209_v45 }
  0xfe   :  { %2095 = vmatprep.subr.mxu0 %v2617_v0  ;;  %2130 = vmatprep.subr.mxu1 %v2617_v0 }
 0x101   :  { %2096 = vmatpush3.xpose.msra.mxu0 %v192_v46  ;;  %2131 = vmatpush3.xpose.msra.mxu1 %v208_v47  ;;  %v891_v46 = vld [vmem:[#allocation7 + $0x78] sm:$0xff]  ;;  %v890_v47 = vld [vmem:[#allocation7 + $0x70] sm:$0xff] }
 0x102   :  { %2097 = vmatprep.subr.mxu0 %v2617_v0  ;;  %2132 = vmatprep.subr.mxu1 %v2617_v0 }
 0x105   :  { %2098 = vmatpush3.xpose.msra.mxu0 %v191_v48  ;;  %2133 = vmatpush3.xpose.msra.mxu1 %v207_v49  ;;  %v907_v49 = vld [vmem:[#allocation7 + $0xf8] sm:$0xff] }
 0x106   :  { %2099 = vmatprep.subr.mxu0 %v2617_v0  ;;  %2134 = vmatprep.subr.mxu1 %v2617_v0 }
 0x109   :  { %2100 = vmatpush3.xpose.msra.mxu0 %v190_v50  ;;  %2135 = vmatpush3.xpose.msra.mxu1 %v206_v51  ;;  %v889_v50 = vld [vmem:[#allocation7 + $0x68] sm:$0xff] }
 0x10a   :  { %2101 = vmatprep.subr.mxu0 %v2617_v0  ;;  %2136 = vmatprep.subr.mxu1 %v2617_v0 }
 0x10d   :  { %2102 = vmatpush3.xpose.msra.mxu0 %v189_v52  ;;  %2137 = vmatpush3.xpose.msra.mxu1 %v205_v53  ;;  %v888_v52 = vld [vmem:[#allocation7 + $0x60] sm:$0xff]  ;;  %v906_v53 = vld [vmem:[#allocation7 + $0xf0] sm:$0xff] }
 0x10e   :  { %2103 = vmatprep.subr.mxu0 %v2617_v0  ;;  %2138 = vmatprep.subr.mxu1 %v2617_v0 }
 0x111   :  { %2104 = vmatpush3.xpose.msra.mxu0 %v188_v54  ;;  %2139 = vmatpush3.xpose.msra.mxu1 %v204_v55  ;;  %v887_v54 = vld [vmem:[#allocation7 + $0x58] sm:$0xff]  ;;  %v905_v55 = vld [vmem:[#allocation7 + $0xe8] sm:$0xff] }
 0x112   :  { %2105 = vmatprep.subr.mxu0 %v2617_v0  ;;  %2140 = vmatprep.subr.mxu1 %v2617_v0 }
 0x115   :  { %2106 = vmatpush3.xpose.msra.mxu0 %v187_v56  ;;  %2141 = vmatpush3.xpose.msra.mxu1 %v203_v57  ;;  %v886_v57 = vld [vmem:[#allocation7 + $0x50] sm:$0xff] }
 0x116   :  { %2107 = vmatprep.subr.mxu0 %v2617_v0  ;;  %2142 = vmatprep.subr.mxu1 %v2617_v0 }
 0x119   :  { %2108 = vmatpush3.xpose.msra.mxu0 %v186_v58  ;;  %2143 = vmatpush3.xpose.msra.mxu1 %v202_v59  ;;  %v904_v58 = vld [vmem:[#allocation7 + $0xe0] sm:$0xff]  ;;  %v885_v59 = vld [vmem:[#allocation7 + $0x48] sm:$0xff] }
 0x11a   :  { %2109 = vmatprep.subr.mxu0 %v2617_v0  ;;  %2144 = vmatprep.subr.mxu1 %v2617_v0 }
 0x11d   :  { %2110 = vmatpush3.xpose.msra.mxu0 %v185_v60  ;;  %2145 = vmatpush3.xpose.msra.mxu1 %v201_v61  ;;  %v903_v60 = vld [vmem:[#allocation7 + $0xd8] sm:$0xff]  ;;  %v884_v61 = vld [vmem:[#allocation7 + $0x40] sm:$0xff] }
 0x11e   :  { %2111 = vmatprep.subr.mxu0 %v2617_v0  ;;  %2146 = vmatprep.subr.mxu1 %v2617_v0 }
 0x121   :  { %2112 = vmatpush3.xpose.msra.mxu0 %v184_v62  ;;  %2147 = vmatpush3.xpose.msra.mxu1 %v200_v63  ;;  %v902_v62 = vld [vmem:[#allocation7 + $0xd0] sm:$0xff]  ;;  %v883_v63 = vld [vmem:[#allocation7 + $0x38] sm:$0xff] }
 0x122   :  { %2113 = vmatprep.subr.mxu0 %v2617_v0  ;;  %2148 = vmatprep.subr.mxu1 %v2617_v0 }
 0x125   :  { %2114 = vmatpush3.xpose.msra.mxu0 %v183_v1  ;;  %2149 = vmatpush3.xpose.msra.mxu1 %v199_v2  ;;  %v901_v1 = vld [vmem:[#allocation7 + $0xc8] sm:$0xff]  ;;  %v882_v2 = vld [vmem:[#allocation7 + $0x30] sm:$0xff] }
 0x126   :  { %2115 = vmatprep.subr.mxu0 %v2617_v0  ;;  %2150 = vmatprep.subr.mxu1 %v2617_v0 }
 0x129   :  { %2116 = vmatpush3.xpose.msra.mxu0 %v182_v3  ;;  %2151 = vmatpush3.xpose.msra.mxu1 %v198_v4  ;;  %v900_v3 = vld [vmem:[#allocation7 + $0xc0] sm:$0xff]  ;;  %v881_v4 = vld [vmem:[#allocation7 + $0x28] sm:$0xff] }
 0x12a   :  { %2117 = vmatprep.subr.mxu0 %v2617_v0  ;;  %2152 = vmatprep.subr.mxu1 %v2617_v0 }
 0x12d   :  { %2118 = vmatpush3.xpose.msra.mxu0 %v181_v5  ;;  %2153 = vmatpush3.xpose.msra.mxu1 %v197_v6  ;;  %v899_v5 = vld [vmem:[#allocation7 + $0xb8] sm:$0xff]  ;;  %v880_v6 = vld [vmem:[#allocation7 + $0x20] sm:$0xff] }
 0x12e   :  { %2119 = vmatprep.subr.mxu0 %v2617_v0  ;;  %2154 = vmatprep.subr.mxu1 %v2617_v0 }
 0x131   :  { %2120 = vmatpush3.xpose.msra.mxu0 %v180_v7  ;;  %2155 = vmatpush3.xpose.msra.mxu1 %v196_v8  ;;  %v898_v7 = vld [vmem:[#allocation7 + $0xb0] sm:$0xff]  ;;  %v879_v8 = vld [vmem:[#allocation7 + $0x18] sm:$0xff] }
 0x132   :  { %2159 = vmatprep.subr.mxu0 %v2617_v0  ;;  %2194 = vmatprep.subr.mxu1 %v2617_v0 }
 0x134   :  { %v278_v11 = vpop.f32.mrf.mxu0  ;;  %v348_v12 = vpop.f32.mrf.mxu1  ;;  %2122 = vmatmul.mubr.f32.vlgmr.msra.gmra.mxu0 %v82_v9  ;;  %2157 = vmatmul.mubr.f32.vlgmr.msra.gmra.mxu1 %v83_v10  ;;  %v897_v9 = vld [vmem:[#allocation7 + $0xa8] sm:$0xff]  ;;  %v878_v10 = vld [vmem:[#allocation7 + $0x10] sm:$0xff] }
 0x135   :  { %v772_v14 = vmul.f32 0.17677669, %v278_v11  ;;  %2191 = vmatprep.mubr.msk.f32.mxu0 %vm2618_vm0, %v2617_v0  ;;  %2226 = vmatprep.mubr.msk.f32.mxu1 %vm2618_vm0, %v2617_v0  ;;  %v773_v17 = vmul.f32 0.17677669, %v348_v12  ;;  %v896_v11 = vld [vmem:[#allocation7 + $0xa0] sm:$0xff]  ;;  %v877_v12 = vld [vmem:[#allocation7 + $0x8] sm:$0xff] }
 0x136   :  { %v1913_v15 = vpop.f32.mrf.mxu0  ;;  %v1948_v16 = vpop.f32.mrf.mxu1  ;;  %2160 = vmatpush3.msra.mxu0 %v891_v46  ;;  %2195 = vmatpush3.msra.mxu1 %v907_v49  ;;  %v922_v49 = vld [vmem:[#allocation7 + $0x170] sm:$0xff] }
 0x137   :  { %v788_v18 = vadd.f32 %v780_v13, %v772_v14  ;;  %v789_v20 = vadd.f32 %v781_v19, %v773_v17  ;;  %2161 = vmatprep.subr.mxu0 %v2617_v0  ;;  %2196 = vmatprep.subr.mxu1 %v2617_v0  ;;  %v895_v13 = vld [vmem:[#allocation7 + $0x98] sm:$0xff]  ;;  %v876_v14 = vld [vmem:[#allocation7] sm:$0xff]  ;;  %v894_v15 = vld [vmem:[#allocation7 + $0x90] sm:$0xff] }
 0x138   :  { %2162 = vmatpush3.msra.mxu0 %v890_v47  ;;  %2197 = vmatpush3.msra.mxu1 %v906_v53  ;;  %v893_v16 = vld [vmem:[#allocation7 + $0x88] sm:$0xff]  ;;  %v892_v17 = vld [vmem:[#allocation7 + $0x80] sm:$0xff] }
 0x139   :  { %796 = vmax.xlane.f32.xlu0 %v788_v18  ;;  %2163 = vmatprep.subr.mxu0 %v2617_v0  ;;  %v921_v53 = vld [vmem:[#allocation7 + $0x168] sm:$0xff] }
 0x13a   :  { %2164 = vmatpush3.msra.mxu0 %v889_v50  ;;  %2198 = vmatprep.subr.mxu1 %v2617_v0 }
 0x13b   :  { %2165 = vmatprep.subr.mxu0 %v2617_v0  ;;  %2199 = vmatpush3.msra.mxu1 %v905_v55  ;;  %v938_v55 = vld [vmem:[#allocation7 + $0x1f0] sm:$0xff] }
 0x13c   :  { %2166 = vmatpush3.msra.mxu0 %v888_v52  ;;  %2200 = vmatprep.subr.mxu1 %v2617_v0 }
 0x13d   :  { %798 = vmax.xlane.f32.xlu0 %v789_v20  ;;  %2167 = vmatprep.subr.mxu0 %v2617_v0 }
 0x13e   :  { %2168 = vmatpush3.msra.mxu0 %v887_v54  ;;  %2201 = vmatpush3.msra.mxu1 %v904_v58  ;;  %v939_v54 = vld [vmem:[#allocation7 + $0x1f8] sm:$0xff]  ;;  %v937_v58 = vld [vmem:[#allocation7 + $0x1e8] sm:$0xff] }
 0x13f   :  { %2169 = vmatprep.subr.mxu0 %v2617_v0  ;;  %2202 = vmatprep.subr.mxu1 %v2617_v0 }
 0x140   :  { %2170 = vmatpush3.msra.mxu0 %v886_v57  ;;  %2203 = vmatpush3.msra.mxu1 %v903_v60  ;;  %v919_v57 = vld [vmem:[#allocation7 + $0x158] sm:$0xff]  ;;  %v917_v60 = vld [vmem:[#allocation7 + $0x148] sm:$0xff] }
 0x141   :  { %2171 = vmatprep.subr.mxu0 %v2617_v0  ;;  %2204 = vmatprep.subr.mxu1 %v2617_v0 }
 0x142   :  { %2172 = vmatpush3.msra.mxu0 %v885_v59  ;;  %2205 = vmatpush3.msra.mxu1 %v902_v62  ;;  %v936_v59 = vld [vmem:[#allocation7 + $0x1e0] sm:$0xff] }
 0x143   :  { %2173 = vmatprep.subr.mxu0 %v2617_v0  ;;  %2206 = vmatprep.subr.mxu1 %v2617_v0  ;;  %v916_v62 = vld [vmem:[#allocation7 + $0x140] sm:$0xff] }
 0x144   :  { %2174 = vmatpush3.msra.mxu0 %v884_v61  ;;  %2207 = vmatpush3.msra.mxu1 %v901_v1  ;;  %v935_v61 = vld [vmem:[#allocation7 + $0x1d8] sm:$0xff] }
 0x145   :  { %2175 = vmatprep.subr.mxu0 %v2617_v0  ;;  %2208 = vmatprep.subr.mxu1 %v2617_v0  ;;  %v915_v1 = vld [vmem:[#allocation7 + $0x138] sm:$0xff] }
 0x146   :  { %2176 = vmatpush3.msra.mxu0 %v883_v63  ;;  %2209 = vmatpush3.msra.mxu1 %v900_v3  ;;  %v934_v63 = vld [vmem:[#allocation7 + $0x1d0] sm:$0xff]  ;;  %v932_v3 = vld [vmem:[#allocation7 + $0x1c0] sm:$0xff] }
 0x147   :  { %2177 = vmatprep.subr.mxu0 %v2617_v0  ;;  %2210 = vmatprep.subr.mxu1 %v2617_v0 }
 0x148   :  { %2178 = vmatpush3.msra.mxu0 %v882_v2  ;;  %2211 = vmatpush3.msra.mxu1 %v899_v5  ;;  %v933_v2 = vld [vmem:[#allocation7 + $0x1c8] sm:$0xff] }
 0x149   :  { %2179 = vmatprep.subr.mxu0 %v2617_v0  ;;  %2212 = vmatprep.subr.mxu1 %v2617_v0  ;;  %v913_v5 = vld [vmem:[#allocation7 + $0x128] sm:$0xff] }
 0x14a   :  { %2180 = vmatpush3.msra.mxu0 %v881_v4  ;;  %2213 = vmatpush3.msra.mxu1 %v898_v7  ;;  %v914_v4 = vld [vmem:[#allocation7 + $0x130] sm:$0xff] }
 0x14b   :  { %2181 = vmatprep.subr.mxu0 %v2617_v0  ;;  %2214 = vmatprep.subr.mxu1 %v2617_v0 }
 0x14c   :  { %2182 = vmatpush3.msra.mxu0 %v880_v6  ;;  %2215 = vmatpush3.msra.mxu1 %v897_v9  ;;  %v931_v6 = vld [vmem:[#allocation7 + $0x1b8] sm:$0xff] }
 0x14d   :  { %2183 = vmatprep.subr.mxu0 %v2617_v0  ;;  %2216 = vmatprep.subr.mxu1 %v2617_v0 }
 0x14e   :  { %2184 = vmatpush3.msra.mxu0 %v879_v8  ;;  %2217 = vmatpush3.msra.mxu1 %v896_v11  ;;  %v912_v11 = vld [vmem:[#allocation7 + $0x120] sm:$0xff] }
 0x14f   :  { %2185 = vmatprep.subr.mxu0 %v2617_v0  ;;  %2218 = vmatprep.subr.mxu1 %v2617_v0 }
 0x150   :  { %2186 = vmatpush3.msra.mxu0 %v878_v10  ;;  %2219 = vmatpush3.msra.mxu1 %v895_v13 }
 0x151   :  { %2187 = vmatprep.subr.mxu0 %v2617_v0  ;;  %2220 = vmatprep.subr.mxu1 %v2617_v0 }
 0x152   :  { %2188 = vmatpush3.msra.mxu0 %v877_v12  ;;  %2221 = vmatpush3.msra.mxu1 %v894_v15  ;;  %v930_v12 = vld [vmem:[#allocation7 + $0x1b0] sm:$0xff]  ;;  %v911_v15 = vld [vmem:[#allocation7 + $0x118] sm:$0xff] }
 0x153   :  { %2189 = vmatprep.subr.mxu0 %v2617_v0  ;;  %2222 = vmatprep.subr.mxu1 %v2617_v0 }
 0x154   :  { %2190 = vmatpush3.msra.mxu0 %v876_v14  ;;  %2223 = vmatpush3.msra.mxu1 %v893_v16  ;;  %v929_v16 = vld [vmem:[#allocation7 + $0x1a8] sm:$0xff] }
 0x155   :  { %2229 = vmatprep.subr.mxu0 %v2617_v0  ;;  %2224 = vmatprep.subr.mxu1 %v2617_v0 }
 0x156   :  { %2225 = vmatpush3.msra.mxu1 %v892_v17  ;;  %v910_v17 = vld [vmem:[#allocation7 + $0x110] sm:$0xff] }
 0x157   :  { %2264 = vmatprep.subr.mxu1 %v2617_v0 }
 0x174   :  { %v418_v21 = vpop.f32.mrf.mxu0  ;;  %v488_v22 = vpop.f32.mrf.mxu1 }
 0x175   :  { %v774_v24 = vmul.f32 0.17677669, %v418_v21  ;;  %v775_v27 = vmul.f32 0.17677669, %v488_v22  ;;  %v786_v21 = vld [vmem:[#allocation8 + $0x30] sm:$0xff] }
 0x176   :  { %v1983_v25 = vpop.f32.mrf.mxu0  ;;  %v2018_v26 = vpop.f32.mrf.mxu1 }
 0x177   :  { %v2825_v28 = vadd.f32 %v782_v23, %v774_v24  ;;  %v2828_v30 = vadd.f32 %v783_v29, %v775_v27 }
 0x179   :  { %800 = vmax.xlane.f32.xlu1 %v2825_v28 }
 0x17d   :  { %802 = vmax.xlane.f32.xlu1 %v2828_v30 }
 0x1b4   :  { %v558_v31 = vpop.f32.mrf.mxu0  ;;  %v628_v32 = vpop.f32.mrf.mxu1 }
 0x1b5   :  { %v776_v35 = vmul.f32 0.17677669, %v558_v31  ;;  %v777_v36 = vmul.f32 0.17677669, %v628_v32 }
 0x1b6   :  { %v2053_v37 = vpop.f32.mrf.mxu0  ;;  %v2088_v38 = vpop.f32.mrf.mxu1 }
 0x1b7   :  { %v2831_v39 = vadd.f32 %v785_v33, %v777_v36  ;;  %v2833_v40 = vadd.f32 %v784_v34, %v776_v35 }
 0x1b9   :  { %806 = vmax.xlane.f32.xlu1 %v2831_v39  ;;  %804 = vmax.xlane.f32.xlu0 %v2833_v40 }
 0x1c2   :  { %v797_v41 = vpop.xlane.xlu0 %796 }
 0x1c3   :  { %v812_v42 = vsub.f32 %v788_v18, %v797_v41 }
 0x1c5   :  { %v820_v43 = vmul.f32 1.442695, %v812_v42 }
 0x1c6   :  { %v799_v44 = vpop.xlane.xlu0 %798 }
 0x1c7   :  { %2449 = vpow2.f32 %v820_v43  ;;  %v813_v45 = vsub.f32 %v789_v20, %v799_v44  ;;  %v787_v20 = vld [vmem:[#allocation8 + $0x38] sm:$0xff] }
 0x1c9   :  { %v822_v48 = vmul.f32 1.442695, %v813_v45 }
 0x1cb   :  { %2451 = vpow2.f32 %v822_v48 }
 0x1d4   :  { %v2841_v51 = vpop.eup %2449 }
 0x1d5   :  { %836 = vadd.xlane.f32.xlu0 %v2841_v51 }
 0x1d8   :  { %v2844_v56 = vpop.eup %2451 }
 0x1d9   :  { %838 = vadd.xlane.f32.xlu1 %v2844_v56 }
 0x1f4   :  { %v698_v18 = vpop.f32.mrf.mxu0  ;;  %v768_v19 = vpop.f32.mrf.mxu1 }
 0x1f5   :  { %v778_v22 = vmul.f32 0.17677669, %v698_v18  ;;  %v779_v23 = vmul.f32 0.17677669, %v768_v19  ;;  %v928_v18 = vld [vmem:[#allocation7 + $0x1a0] sm:$0xff]  ;;  %v909_v19 = vld [vmem:[#allocation7 + $0x108] sm:$0xff] }
 0x1f6   :  { %v2123_v24 = vpop.f32.mrf.mxu0  ;;  %v2158_v25 = vpop.f32.mrf.mxu1 }
 0x1f7   :  { %v2875_v26 = vadd.f32 %v787_v20, %v779_v23  ;;  %v2877_v27 = vadd.f32 %v786_v21, %v778_v22  ;;  %v927_v20 = vld [vmem:[#allocation7 + $0x198] sm:$0xff]  ;;  %v908_v21 = vld [vmem:[#allocation7 + $0x100] sm:$0xff]  ;;  %v926_v22 = vld [vmem:[#allocation7 + $0x190] sm:$0xff] }
 0x1f8   :  { %v925_v23 = vld [vmem:[#allocation7 + $0x188] sm:$0xff]  ;;  %v924_v24 = vld [vmem:[#allocation7 + $0x180] sm:$0xff] }
 0x1f9   :  { %810 = vmax.xlane.f32.xlu1 %v2875_v26  ;;  %808 = vmax.xlane.f32.xlu0 %v2877_v27 }
 0x202   :  { %v801_v29 = vpop.xlane.xlu1 %800 }
 0x203   :  { %v814_v31 = vsub.f32 %v2825_v28, %v801_v29 }
 0x205   :  { %v824_v32 = vmul.f32 1.442695, %v814_v31 }
 0x206   :  { %v803_v33 = vpop.xlane.xlu1 %802 }
 0x207   :  { %2453 = vpow2.f32 %v824_v32  ;;  %v815_v34 = vsub.f32 %v2828_v30, %v803_v33  ;;  %v955_v33 = vld [vmem:[#allocation7 + $0x278] sm:$0xff] }
 0x209   :  { %v826_v35 = vmul.f32 1.442695, %v815_v34  ;;  %v954_v34 = vld [vmem:[#allocation7 + $0x270] sm:$0xff] }
 0x20b   :  { %2455 = vpow2.f32 %v826_v35 }
 0x214   :  { %v2883_v36 = vpop.eup %2453 }
 0x215   :  { %840 = vadd.xlane.f32.xlu0 %v2883_v36 }
 0x218   :  { %v2886_v37 = vpop.eup %2455 }
 0x219   :  { %842 = vadd.xlane.f32.xlu1 %v2886_v37 }
 0x242   :  { %v807_v38 = vpop.xlane.xlu1 %806  ;;  %v805_v41 = vpop.xlane.xlu0 %804 }
 0x243   :  { %v817_v42 = vsub.f32 %v2831_v39, %v807_v38  ;;  %v816_v28 = vsub.f32 %v2833_v40, %v805_v41  ;;  %v923_v40 = vld [vmem:[#allocation7 + $0x178] sm:$0xff] }
 0x244   :  { %v971_v41 = vld [vmem:[#allocation7 + $0x2f8] sm:$0xff] }
 0x245   :  { %v830_v43 = vmul.f32 1.442695, %v817_v42  ;;  %v828_v44 = vmul.f32 1.442695, %v816_v28  ;;  %v953_v42 = vld [vmem:[#allocation7 + $0x268] sm:$0xff]  ;;  %v970_v28 = vld [vmem:[#allocation7 + $0x2f0] sm:$0xff] }
 0x247   :  { %2457 = vpow2.f32 %v830_v43  ;;  %v969_v43 = vld [vmem:[#allocation7 + $0x2e8] sm:$0xff] }
 0x248   :  { %2459 = vpow2.f32 %v828_v44  ;;  %v951_v44 = vld [vmem:[#allocation7 + $0x258] sm:$0xff] }
 0x254   :  { %v2891_v30 = vpop.eup %2457 }
 0x255   :  { %v2893_v45 = vpop.eup %2459  ;;  %846 = vadd.xlane.f32.xlu1 %v2891_v30 }
 0x256   :  { %844 = vadd.xlane.f32.xlu0 %v2893_v45 }
 0x25e   :  { %v837_v46 = vpop.xlane.xlu0 %836 }
 0x25f   :  { %2461 = vrcp.f32 %v837_v46  ;;  %v950_v46 = vld [vmem:[#allocation7 + $0x250] sm:$0xff] }
 0x262   :  { %v839_v47 = vpop.xlane.xlu1 %838 }
 0x263   :  { %2463 = vrcp.f32 %v839_v47  ;;  %v967_v47 = vld [vmem:[#allocation7 + $0x2d8] sm:$0xff] }
 0x26c   :  { %v2462_v48 = vpop.eup %2461 }
 0x26d   :  { %v860_v39 = vmul.f32 %v2462_v48, %v2841_v51  ;;  %v920_v51 = vld [vmem:[#allocation7 + $0x160] sm:$0xff]  ;;  %v949_v48 = vld [vmem:[#allocation7 + $0x248] sm:$0xff] }
 0x26f   :  { %868 = vst [vmem:[#allocation11] sm:$0xff] %v860_v39  ;;  %2192 = vmatmul.mubr.f32.vlgmr.msra.gmra.mxu0 %v860_v39  ;;  %v966_v39 = vld [vmem:[#allocation7 + $0x2d0] sm:$0xff] }
 0x270   :  { %v2464_v50 = vpop.eup %2463  ;;  %2230 = vmatpush3.msra.mxu0 %v923_v40  ;;  %2261 = vmatprep.mubr.msk.f32.mxu0 %vm2618_vm0, %v2617_v0  ;;  %v948_v40 = vld [vmem:[#allocation7 + $0x240] sm:$0xff] }
 0x271   :  { %v861_v52 = vmul.f32 %v2464_v50, %v2844_v56  ;;  %2231 = vmatprep.subr.mxu0 %v2617_v0  ;;  %v918_v56 = vld [vmem:[#allocation7 + $0x150] sm:$0xff]  ;;  %v947_v50 = vld [vmem:[#allocation7 + $0x238] sm:$0xff] }
 0x272   :  { %2232 = vmatpush3.msra.mxu0 %v922_v49  ;;  %v965_v49 = vld [vmem:[#allocation7 + $0x2c8] sm:$0xff] }
 0x273   :  { %869 = vst [vmem:[#allocation11 + $0x8] sm:$0xff] %v861_v52  ;;  %2227 = vmatmul.mubr.f32.vlgmr.msra.gmra.mxu1 %v861_v52  ;;  %2233 = vmatprep.subr.mxu0 %v2617_v0  ;;  %v964_v52 = vld [vmem:[#allocation7 + $0x2c0] sm:$0xff] }
 0x274   :  { %2234 = vmatpush3.msra.mxu0 %v921_v53  ;;  %2265 = vmatpush3.msra.mxu1 %v939_v54  ;;  %v946_v53 = vld [vmem:[#allocation7 + $0x230] sm:$0xff]  ;;  %v963_v54 = vld [vmem:[#allocation7 + $0x2b8] sm:$0xff] }
 0x275   :  { %2266 = vmatprep.subr.mxu1 %v2617_v0  ;;  %2235 = vmatprep.subr.mxu0 %v2617_v0 }
 0x276   :  { %2236 = vmatpush3.msra.mxu0 %v920_v51  ;;  %2267 = vmatpush3.msra.mxu1 %v938_v55  ;;  %v945_v51 = vld [vmem:[#allocation7 + $0x228] sm:$0xff]  ;;  %v962_v55 = vld [vmem:[#allocation7 + $0x2b0] sm:$0xff] }
 0x277   :  { %2237 = vmatprep.subr.mxu0 %v2617_v0  ;;  %2268 = vmatprep.subr.mxu1 %v2617_v0 }
 0x278   :  { %2238 = vmatpush3.msra.mxu0 %v919_v57  ;;  %2269 = vmatpush3.msra.mxu1 %v937_v58  ;;  %v944_v57 = vld [vmem:[#allocation7 + $0x220] sm:$0xff]  ;;  %v961_v58 = vld [vmem:[#allocation7 + $0x2a8] sm:$0xff] }
 0x279   :  { %2239 = vmatprep.subr.mxu0 %v2617_v0  ;;  %2270 = vmatprep.subr.mxu1 %v2617_v0 }
 0x27a   :  { %2240 = vmatpush3.msra.mxu0 %v918_v56  ;;  %2271 = vmatpush3.msra.mxu1 %v936_v59  ;;  %v943_v56 = vld [vmem:[#allocation7 + $0x218] sm:$0xff]  ;;  %v960_v59 = vld [vmem:[#allocation7 + $0x2a0] sm:$0xff] }
 0x27b   :  { %2241 = vmatprep.subr.mxu0 %v2617_v0  ;;  %2272 = vmatprep.subr.mxu1 %v2617_v0 }
 0x27c   :  { %2242 = vmatpush3.msra.mxu0 %v917_v60  ;;  %2273 = vmatpush3.msra.mxu1 %v935_v61  ;;  %v942_v60 = vld [vmem:[#allocation7 + $0x210] sm:$0xff]  ;;  %v959_v61 = vld [vmem:[#allocation7 + $0x298] sm:$0xff] }
 0x27d   :  { %2243 = vmatprep.subr.mxu0 %v2617_v0  ;;  %2274 = vmatprep.subr.mxu1 %v2617_v0 }
 0x27e   :  { %2244 = vmatpush3.msra.mxu0 %v916_v62  ;;  %2275 = vmatpush3.msra.mxu1 %v934_v63  ;;  %v941_v62 = vld [vmem:[#allocation7 + $0x208] sm:$0xff]  ;;  %v958_v63 = vld [vmem:[#allocation7 + $0x290] sm:$0xff] }
 0x27f   :  { %2245 = vmatprep.subr.mxu0 %v2617_v0  ;;  %2276 = vmatprep.subr.mxu1 %v2617_v0 }
 0x280   :  { %2246 = vmatpush3.msra.mxu0 %v915_v1  ;;  %2277 = vmatpush3.msra.mxu1 %v933_v2  ;;  %v940_v1 = vld [vmem:[#allocation7 + $0x200] sm:$0xff]  ;;  %v957_v2 = vld [vmem:[#allocation7 + $0x288] sm:$0xff] }
 0x281   :  { %2247 = vmatprep.subr.mxu0 %v2617_v0  ;;  %2278 = vmatprep.subr.mxu1 %v2617_v0 }
 0x282   :  { %v811_v7 = vpop.xlane.xlu1 %810  ;;  %v809_v8 = vpop.xlane.xlu0 %808  ;;  %2279 = vmatpush3.msra.mxu1 %v932_v3  ;;  %2248 = vmatpush3.msra.mxu0 %v914_v4  ;;  %v956_v3 = vld [vmem:[#allocation7 + $0x280] sm:$0xff] }
 0x283   :  { %v819_v9 = vsub.f32 %v2875_v26, %v811_v7  ;;  %v818_v10 = vsub.f32 %v2877_v27, %v809_v8  ;;  %2249 = vmatprep.subr.mxu0 %v2617_v0  ;;  %2280 = vmatprep.subr.mxu1 %v2617_v0 }
 0x284   :  { %2250 = vmatpush3.msra.mxu0 %v913_v5  ;;  %2281 = vmatpush3.msra.mxu1 %v931_v6 }
 0x285   :  { %v834_v13 = vmul.f32 1.442695, %v819_v9  ;;  %v832_v14 = vmul.f32 1.442695, %v818_v10  ;;  %2251 = vmatprep.subr.mxu0 %v2617_v0  ;;  %2282 = vmatprep.subr.mxu1 %v2617_v0  ;;  %v1003_v9 = vld [vmem:[#allocation7 + $0x3f8] sm:$0xff] }
 0x286   :  { %2252 = vmatpush3.msra.mxu0 %v912_v11  ;;  %2283 = vmatpush3.msra.mxu1 %v930_v12  ;;  %v987_v11 = vld [vmem:[#allocation7 + $0x378] sm:$0xff]  ;;  %v1002_v12 = vld [vmem:[#allocation7 + $0x3f0] sm:$0xff] }
 0x287   :  { %2465 = vpow2.f32 %v834_v13  ;;  %2253 = vmatprep.subr.mxu0 %v2617_v0  ;;  %2284 = vmatprep.subr.mxu1 %v2617_v0  ;;  %v986_v13 = vld [vmem:[#allocation7 + $0x370] sm:$0xff] }
 0x288   :  { %2467 = vpow2.f32 %v832_v14  ;;  %2254 = vmatpush3.msra.mxu0 %v911_v15  ;;  %2285 = vmatpush3.msra.mxu1 %v929_v16  ;;  %v1001_v14 = vld [vmem:[#allocation7 + $0x3e8] sm:$0xff]  ;;  %v999_v16 = vld [vmem:[#allocation7 + $0x3d8] sm:$0xff] }
 0x289   :  { %2255 = vmatprep.subr.mxu0 %v2617_v0  ;;  %2286 = vmatprep.subr.mxu1 %v2617_v0  ;;  %v985_v15 = vld [vmem:[#allocation7 + $0x368] sm:$0xff] }
 0x28a   :  { %2256 = vmatpush3.msra.mxu0 %v910_v17  ;;  %2287 = vmatpush3.msra.mxu1 %v928_v18  ;;  %v983_v17 = vld [vmem:[#allocation7 + $0x358] sm:$0xff]  ;;  %v998_v18 = vld [vmem:[#allocation7 + $0x3d0] sm:$0xff] }
 0x28b   :  { %2257 = vmatprep.subr.mxu0 %v2617_v0  ;;  %2288 = vmatprep.subr.mxu1 %v2617_v0 }
 0x28c   :  { %2258 = vmatpush3.msra.mxu0 %v909_v19  ;;  %2289 = vmatpush3.msra.mxu1 %v927_v20  ;;  %v982_v19 = vld [vmem:[#allocation7 + $0x350] sm:$0xff]  ;;  %v997_v20 = vld [vmem:[#allocation7 + $0x3c8] sm:$0xff] }
 0x28d   :  { %2259 = vmatprep.subr.mxu0 %v2617_v0  ;;  %2290 = vmatprep.subr.mxu1 %v2617_v0 }
 0x28e   :  { %2260 = vmatpush3.msra.mxu0 %v908_v21  ;;  %2291 = vmatpush3.msra.mxu1 %v926_v22  ;;  %v981_v21 = vld [vmem:[#allocation7 + $0x348] sm:$0xff]  ;;  %v996_v22 = vld [vmem:[#allocation7 + $0x3c0] sm:$0xff] }
 0x28f   :  { %2292 = vmatprep.subr.mxu1 %v2617_v0  ;;  %2296 = vmatprep.mubr.msk.f32.mxu1 %vm2618_vm0, %v2617_v0 }
 0x290   :  { %2293 = vmatpush3.msra.mxu1 %v925_v23  ;;  %2299 = vmatprep.subr.mxu0 %v2617_v0  ;;  %v980_v23 = vld [vmem:[#allocation7 + $0x340] sm:$0xff] }
 0x291   :  { %2294 = vmatprep.subr.mxu1 %v2617_v0 }
 0x292   :  { %2295 = vmatpush3.msra.mxu1 %v924_v24  ;;  %v995_v24 = vld [vmem:[#allocation7 + $0x3b8] sm:$0xff] }
 0x293   :  { %2334 = vmatprep.subr.mxu1 %v2617_v0 }
 0x294   :  { %v2937_v25 = vpop.eup %2465 }
 0x295   :  { %v2939_v26 = vpop.eup %2467  ;;  %850 = vadd.xlane.f32.xlu1 %v2937_v25 }
 0x296   :  { %848 = vadd.xlane.f32.xlu0 %v2939_v26 }
 0x29e   :  { %v841_v27 = vpop.xlane.xlu0 %840 }
 0x29f   :  { %2469 = vrcp.f32 %v841_v27  ;;  %v979_v27 = vld [vmem:[#allocation7 + $0x338] sm:$0xff] }
 0x2a2   :  { %v843_v29 = vpop.xlane.xlu1 %842 }
 0x2a3   :  { %2471 = vrcp.f32 %v843_v29  ;;  %v994_v29 = vld [vmem:[#allocation7 + $0x3b0] sm:$0xff] }
 0x2ac   :  { %v2470_v31 = vpop.eup %2469 }
 0x2ad   :  { %v862_v32 = vmul.f32 %v2470_v31, %v2883_v36  ;;  %v952_v36 = vld [vmem:[#allocation7 + $0x260] sm:$0xff]  ;;  %v978_v31 = vld [vmem:[#allocation7 + $0x330] sm:$0xff] }
 0x2af   :  { %870 = vst [vmem:[#allocation11 + $0x10] sm:$0xff] %v862_v32  ;;  %2262 = vmatmul.mubr.f32.vlgmr.msra.gmra.mxu0 %v862_v32  ;;  %v993_v32 = vld [vmem:[#allocation7 + $0x3a8] sm:$0xff] }
 0x2b0   :  { %v2472_v35 = vpop.eup %2471  ;;  %2300 = vmatpush3.msra.mxu0 %v955_v33  ;;  %2331 = vmatprep.mubr.msk.f32.mxu0 %vm2618_vm0, %v2617_v0  ;;  %v977_v33 = vld [vmem:[#allocation7 + $0x328] sm:$0xff] }
 0x2b1   :  { %v863_v38 = vmul.f32 %v2472_v35, %v2886_v37  ;;  %2301 = vmatprep.subr.mxu0 %v2617_v0  ;;  %v968_v37 = vld [vmem:[#allocation7 + $0x2e0] sm:$0xff] }
 0x2b2   :  { %2302 = vmatpush3.msra.mxu0 %v954_v34  ;;  %v992_v34 = vld [vmem:[#allocation7 + $0x3a0] sm:$0xff] }
 0x2b3   :  { %871 = vst [vmem:[#allocation11 + $0x18] sm:$0xff] %v863_v38  ;;  %2297 = vmatmul.mubr.f32.vlgmr.msra.gmra.mxu1 %v863_v38  ;;  %2303 = vmatprep.subr.mxu0 %v2617_v0  ;;  %v976_v35 = vld [vmem:[#allocation7 + $0x320] sm:$0xff]  ;;  %v991_v38 = vld [vmem:[#allocation7 + $0x398] sm:$0xff] }
 0x2b4   :  { %2335 = vmatpush3.msra.mxu1 %v971_v41  ;;  %2304 = vmatpush3.msra.mxu0 %v953_v42  ;;  %v975_v41 = vld [vmem:[#allocation7 + $0x318] sm:$0xff]  ;;  %v990_v42 = vld [vmem:[#allocation7 + $0x390] sm:$0xff] }
 0x2b5   :  { %2336 = vmatprep.subr.mxu1 %v2617_v0  ;;  %2305 = vmatprep.subr.mxu0 %v2617_v0 }
 0x2b6   :  { %2337 = vmatpush3.msra.mxu1 %v970_v28  ;;  %2306 = vmatpush3.msra.mxu0 %v952_v36  ;;  %v974_v28 = vld [vmem:[#allocation7 + $0x310] sm:$0xff]  ;;  %v989_v36 = vld [vmem:[#allocation7 + $0x388] sm:$0xff] }
 0x2b7   :  { %2338 = vmatprep.subr.mxu1 %v2617_v0  ;;  %2307 = vmatprep.subr.mxu0 %v2617_v0 }
 0x2b8   :  { %2339 = vmatpush3.msra.mxu1 %v969_v43  ;;  %2308 = vmatpush3.msra.mxu0 %v951_v44  ;;  %v973_v43 = vld [vmem:[#allocation7 + $0x308] sm:$0xff]  ;;  %v972_v44 = vld [vmem:[#allocation7 + $0x300] sm:$0xff] }
 0x2b9   :  { %2340 = vmatprep.subr.mxu1 %v2617_v0  ;;  %2309 = vmatprep.subr.mxu0 %v2617_v0 }
 0x2ba   :  { %2341 = vmatpush3.msra.mxu1 %v968_v37  ;;  %2310 = vmatpush3.msra.mxu0 %v950_v46  ;;  %v988_v37 = vld [vmem:[#allocation7 + $0x380] sm:$0xff] }
 0x2bb   :  { %2342 = vmatprep.subr.mxu1 %v2617_v0  ;;  %2311 = vmatprep.subr.mxu0 %v2617_v0 }
 0x2bc   :  { %2343 = vmatpush3.msra.mxu1 %v967_v47  ;;  %2312 = vmatpush3.msra.mxu0 %v949_v48 }
 0x2bd   :  { %2344 = vmatprep.subr.mxu1 %v2617_v0  ;;  %2313 = vmatprep.subr.mxu0 %v2617_v0 }
 0x2be   :  { %2345 = vmatpush3.msra.mxu1 %v966_v39  ;;  %2314 = vmatpush3.msra.mxu0 %v948_v40 }
 0x2bf   :  { %2346 = vmatprep.subr.mxu1 %v2617_v0  ;;  %2315 = vmatprep.subr.mxu0 %v2617_v0 }
 0x2c0   :  { %2347 = vmatpush3.msra.mxu1 %v965_v49  ;;  %2316 = vmatpush3.msra.mxu0 %v947_v50 }
 0x2c1   :  { %2348 = vmatprep.subr.mxu1 %v2617_v0  ;;  %2317 = vmatprep.subr.mxu0 %v2617_v0 }
 0x2c2   :  { %2349 = vmatpush3.msra.mxu1 %v964_v52  ;;  %2318 = vmatpush3.msra.mxu0 %v946_v53 }
 0x2c3   :  { %2350 = vmatprep.subr.mxu1 %v2617_v0  ;;  %2319 = vmatprep.subr.mxu0 %v2617_v0 }
 0x2c4   :  { %2351 = vmatpush3.msra.mxu1 %v963_v54  ;;  %2320 = vmatpush3.msra.mxu0 %v945_v51 }
 0x2c5   :  { %2352 = vmatprep.subr.mxu1 %v2617_v0  ;;  %2321 = vmatprep.subr.mxu0 %v2617_v0 }
 0x2c6   :  { %2353 = vmatpush3.msra.mxu1 %v962_v55  ;;  %2322 = vmatpush3.msra.mxu0 %v944_v57 }
 0x2c7   :  { %2354 = vmatprep.subr.mxu1 %v2617_v0  ;;  %2323 = vmatprep.subr.mxu0 %v2617_v0 }
 0x2c8   :  { %2355 = vmatpush3.msra.mxu1 %v961_v58  ;;  %2324 = vmatpush3.msra.mxu0 %v943_v56 }
 0x2c9   :  { %2356 = vmatprep.subr.mxu1 %v2617_v0  ;;  %2325 = vmatprep.subr.mxu0 %v2617_v0 }
 0x2ca   :  { %2357 = vmatpush3.msra.mxu1 %v960_v59  ;;  %2326 = vmatpush3.msra.mxu0 %v942_v60 }
 0x2cb   :  { %2358 = vmatprep.subr.mxu1 %v2617_v0  ;;  %2327 = vmatprep.subr.mxu0 %v2617_v0 }
 0x2cc   :  { %2359 = vmatpush3.msra.mxu1 %v959_v61  ;;  %2328 = vmatpush3.msra.mxu0 %v941_v62 }
 0x2cd   :  { %2360 = vmatprep.subr.mxu1 %v2617_v0  ;;  %2329 = vmatprep.subr.mxu0 %v2617_v0 }
 0x2ce   :  { %2361 = vmatpush3.msra.mxu1 %v958_v63  ;;  %2330 = vmatpush3.msra.mxu0 %v940_v1 }
 0x2cf   :  { %2362 = vmatprep.subr.mxu1 %v2617_v0  ;;  %2366 = vmatprep.mubr.msk.f32.mxu1 %vm2618_vm0, %v2617_v0 }
 0x2d0   :  { %2363 = vmatpush3.msra.mxu1 %v957_v2  ;;  %2369 = vmatprep.subr.mxu0 %v2617_v0 }
 0x2d1   :  { %2364 = vmatprep.subr.mxu1 %v2617_v0 }
 0x2d2   :  { %2365 = vmatpush3.msra.mxu1 %v956_v3 }
 0x2d3   :  { %2404 = vmatprep.subr.mxu1 %v2617_v0 }
 0x2de   :  { %v847_v4 = vpop.xlane.xlu1 %846 }
 0x2df   :  { %2473 = vrcp.f32 %v847_v4  ;;  %v845_v5 = vpop.xlane.xlu0 %844 }
 0x2e0   :  { %2475 = vrcp.f32 %v845_v5 }
 0x2ec   :  { %v2474_v6 = vpop.eup %2473 }
 0x2ed   :  { %v2476_v7 = vpop.eup %2475  ;;  %v865_v8 = vmul.f32 %v2474_v6, %v2891_v30  ;;  %v1000_v30 = vld [vmem:[#allocation7 + $0x3e0] sm:$0xff] }
 0x2ee   :  { %v864_v10 = vmul.f32 %v2476_v7, %v2893_v45  ;;  %v984_v45 = vld [vmem:[#allocation7 + $0x360] sm:$0xff] }
 0x2ef   :  { %873 = vst [vmem:[#allocation11 + $0x28] sm:$0xff] %v865_v8  ;;  %2367 = vmatmul.mubr.f32.vlgmr.msra.gmra.mxu1 %v865_v8 }
 0x2f0   :  { %872 = vst [vmem:[#allocation11 + $0x20] sm:$0xff] %v864_v10  ;;  %2332 = vmatmul.mubr.f32.vlgmr.msra.gmra.mxu0 %v864_v10  ;;  %2405 = vmatpush3.msra.mxu1 %v1003_v9 }
 0x2f1   :  { %2370 = vmatpush3.msra.mxu0 %v987_v11  ;;  %2406 = vmatprep.subr.mxu1 %v2617_v0 }
 0x2f2   :  { %2371 = vmatprep.subr.mxu0 %v2617_v0  ;;  %2407 = vmatpush3.msra.mxu1 %v1002_v12 }
 0x2f3   :  { %2372 = vmatpush3.msra.mxu0 %v986_v13  ;;  %2408 = vmatprep.subr.mxu1 %v2617_v0 }
 0x2f4   :  { %2373 = vmatprep.subr.mxu0 %v2617_v0  ;;  %2409 = vmatpush3.msra.mxu1 %v1001_v14 }
 0x2f5   :  { %2374 = vmatpush3.msra.mxu0 %v985_v15  ;;  %2410 = vmatprep.subr.mxu1 %v2617_v0 }
 0x2f6   :  { %2375 = vmatprep.subr.mxu0 %v2617_v0  ;;  %2411 = vmatpush3.msra.mxu1 %v1000_v30 }
 0x2f7   :  { %2376 = vmatpush3.msra.mxu0 %v984_v45  ;;  %2412 = vmatprep.subr.mxu1 %v2617_v0 }
 0x2f8   :  { %2377 = vmatprep.subr.mxu0 %v2617_v0  ;;  %2413 = vmatpush3.msra.mxu1 %v999_v16 }
 0x2f9   :  { %2378 = vmatpush3.msra.mxu0 %v983_v17  ;;  %2414 = vmatprep.subr.mxu1 %v2617_v0 }
 0x2fa   :  { %2379 = vmatprep.subr.mxu0 %v2617_v0  ;;  %2415 = vmatpush3.msra.mxu1 %v998_v18 }
 0x2fb   :  { %2380 = vmatpush3.msra.mxu0 %v982_v19  ;;  %2416 = vmatprep.subr.mxu1 %v2617_v0 }
 0x2fc   :  { %2381 = vmatprep.subr.mxu0 %v2617_v0  ;;  %2417 = vmatpush3.msra.mxu1 %v997_v20 }
 0x2fd   :  { %2382 = vmatpush3.msra.mxu0 %v981_v21  ;;  %2418 = vmatprep.subr.mxu1 %v2617_v0 }
 0x2fe   :  { %2383 = vmatprep.subr.mxu0 %v2617_v0  ;;  %2419 = vmatpush3.msra.mxu1 %v996_v22 }
 0x2ff   :  { %2384 = vmatpush3.msra.mxu0 %v980_v23  ;;  %2420 = vmatprep.subr.mxu1 %v2617_v0 }
 0x300   :  { %2385 = vmatprep.subr.mxu0 %v2617_v0  ;;  %2421 = vmatpush3.msra.mxu1 %v995_v24 }
 0x301   :  { %2386 = vmatpush3.msra.mxu0 %v979_v27  ;;  %2422 = vmatprep.subr.mxu1 %v2617_v0 }
 0x302   :  { %2387 = vmatprep.subr.mxu0 %v2617_v0  ;;  %2423 = vmatpush3.msra.mxu1 %v994_v29 }
 0x303   :  { %2388 = vmatpush3.msra.mxu0 %v978_v31  ;;  %2424 = vmatprep.subr.mxu1 %v2617_v0 }
 0x304   :  { %2389 = vmatprep.subr.mxu0 %v2617_v0  ;;  %2425 = vmatpush3.msra.mxu1 %v993_v32 }
 0x305   :  { %2390 = vmatpush3.msra.mxu0 %v977_v33  ;;  %2426 = vmatprep.subr.mxu1 %v2617_v0 }
 0x306   :  { %2391 = vmatprep.subr.mxu0 %v2617_v0  ;;  %2427 = vmatpush3.msra.mxu1 %v992_v34 }
 0x307   :  { %2392 = vmatpush3.msra.mxu0 %v976_v35  ;;  %2428 = vmatprep.subr.mxu1 %v2617_v0 }
 0x308   :  { %2393 = vmatprep.subr.mxu0 %v2617_v0  ;;  %2429 = vmatpush3.msra.mxu1 %v991_v38 }
 0x309   :  { %2394 = vmatpush3.msra.mxu0 %v975_v41  ;;  %2430 = vmatprep.subr.mxu1 %v2617_v0 }
 0x30a   :  { %2395 = vmatprep.subr.mxu0 %v2617_v0  ;;  %2431 = vmatpush3.msra.mxu1 %v990_v42 }
 0x30b   :  { %2396 = vmatpush3.msra.mxu0 %v974_v28  ;;  %2432 = vmatprep.subr.mxu1 %v2617_v0 }
 0x30c   :  { %2397 = vmatprep.subr.mxu0 %v2617_v0  ;;  %2433 = vmatpush3.msra.mxu1 %v989_v36 }
 0x30d   :  { %2398 = vmatpush3.msra.mxu0 %v973_v43  ;;  %2434 = vmatprep.subr.mxu1 %v2617_v0 }
 0x30e   :  { %2399 = vmatprep.subr.mxu0 %v2617_v0  ;;  %2401 = vmatprep.mubr.msk.f32.mxu0 %vm2618_vm0, %v2617_v0 }
 0x30f   :  { %2400 = vmatpush3.msra.mxu0 %v972_v44  ;;  %2435 = vmatpush3.msra.mxu1 %v988_v37 }
 0x310   :  { %2436 = vmatprep.mubr.msk.f32.mxu1 %vm2618_vm0, %v2617_v0 }
 0x31e   :  { %v851_v46 = vpop.xlane.xlu1 %850 }
 0x31f   :  { %2477 = vrcp.f32 %v851_v46  ;;  %v849_v47 = vpop.xlane.xlu0 %848 }
 0x320   :  { %2479 = vrcp.f32 %v849_v47 }
 0x32c   :  { %v2478_v48 = vpop.eup %2477 }
 0x32d   :  { %v2480_v39 = vpop.eup %2479  ;;  %v867_v40 = vmul.f32 %v2478_v48, %v2937_v25 }
 0x32e   :  { %v866_v49 = vmul.f32 %v2480_v39, %v2939_v26 }
 0x32f   :  { %v1070_v50 = vpop.f32.mrf.mxu0  ;;  %875 = vst [vmem:[#allocation11 + $0x38] sm:$0xff] %v867_v40  ;;  %2437 = vmatmul.mubr.f32.vlgmr.msra.gmra.mxu1 %v867_v40 }
 0x330   :  { %1564 = vst [vmem:[#allocation10] sm:$0xff] %v1070_v50  ;;  %874 = vst [vmem:[#allocation11 + $0x30] sm:$0xff] %v866_v49  ;;  %2402 = vmatmul.mubr.f32.vlgmr.msra.gmra.mxu0 %v866_v49 }
 0x331   :  { %v2193_v52 = vpop.f32.mrf.mxu0 }
 0x333   :  { %v1140_v53 = vpop.f32.mrf.mxu1 }
 0x334   :  { %1565 = vst [vmem:[#allocation10 + $0x8] sm:$0xff] %v1140_v53 }
 0x335   :  { %v2228_v0 = vpop.f32.mrf.mxu1 }
 0x36f   :  { %v1210_v54 = vpop.f32.mrf.mxu0 }
 0x370   :  { %1566 = vst [vmem:[#allocation10 + $0x10] sm:$0xff] %v1210_v54 }
 0x371   :  { %v2263_v51 = vpop.f32.mrf.mxu0 }
 0x372   :  { %2572 = shalt.err (!%p2569_p10)
}
 0x373   :  { %1595 = dma.vmem_to_hbm [thread:$0]  %s1590_s3, 1024, %s3036_s5, [#allocation12], %s2613_s23, %s2613_s23, %s2614_s24   ;;  %v1280_v25 = vpop.f32.mrf.mxu1 }
 0x374   :  { %1567 = vst [vmem:[#allocation10 + $0x18] sm:$0xff] %v1280_v25  ;;  %s2620_s16 = smov [#allocation10]  }
 0x375   :  { %v2298_v26 = vpop.f32.mrf.mxu1  ;;  %s1577_s17 = sshll.u32 %s2620_s16, 4  ;;  %s1578_s17 = int_to_ptr.vmem [resolvable:$true] %s1577_s17 }
 0x376   :  { %s2581_s18 = scalar_lea.vmem %s1578_s17, 1024  ;;  %p2586_p12 = scmp.lt.s32.totalorder %s1578_s17, %s1578_s17 }
 0x377   :  { %p2582_p11 = scmp.ne.s32.totalorder %s1578_s17, %s2581_s18  ;;  %p2587_p13 = scmp.lt.s32.totalorder %s2581_s18, %s2581_s18 }
 0x379   :  { %p2588_p0 = por %p2587_p13, %p2586_p12 }
 0x37b   :  { %p2589_p1 = pnand %p2588_p0, %p2582_p11 }
 0x3af   :  { %v1420_v55 = vpop.f32.mrf.mxu1 }
 0x3b0   :  { %v1350_v57 = vpop.f32.mrf.mxu0  ;;  %1569 = vst [vmem:[#allocation10 + $0x28] sm:$0xff] %v1420_v55 }
 0x3b1   :  { %1568 = vst [vmem:[#allocation10 + $0x20] sm:$0xff] %v1350_v57  ;;  %v2368_v58 = vpop.f32.mrf.mxu1 }
 0x3b2   :  { %v2333_v56 = vpop.f32.mrf.mxu0 }
 0x3ef   :  { %v1560_v59 = vpop.f32.mrf.mxu1 }
 0x3f0   :  { %v1490_v60 = vpop.f32.mrf.mxu0  ;;  %1571 = vst [vmem:[#allocation10 + $0x38] sm:$0xff] %v1560_v59 }
 0x3f1   :  { %1570 = vst [vmem:[#allocation10 + $0x30] sm:$0xff] %v1490_v60  ;;  %v2438_v61 = vpop.f32.mrf.mxu1 }
 0x3f2   :  { %v2403_v62 = vpop.f32.mrf.mxu0 }
 0x3f3   :  { %2592 = shalt.err (!%p2589_p1)
}
 0x3f4   :  { %1583 = dma.vmem_to_hbm [thread:$0]  %s1578_s17, 1024, %s3035_s4, [#allocation4], %s2613_s23, %s2613_s23, %s2614_s24  }
 0x3f5   :  { %2607 = dma.done.wait [#allocation4], 1024  }
 0x3f6   :  { %2608 = vsyncadd [#allocation4], 4294966272 }
 0x3f7   :  { %2609 = dma.done.wait [#allocation12], 1024  }
 0x3f8   :  { %2610 = vsyncadd [#allocation12], 4294966272 }
 0x3f9   :  { %1602 = vsyncpa [#allocation3], 1 }
 0x3fa   :  { %1603 = vsyncpa [#allocation6], 1 }
 0x3fb   :  { %1604 = vsyncpa [#allocation9], 1 }
 0x3fc   :  { %1605 = vsyncpa [#allocation4], 1 }
 0x3fd   :  { %1606 = vsyncpa [#allocation12], 1 }

</bundles_post_ra>
